<compile_context>
chip_gen: v7x
topology: tpu7x:2x2x1
jax: 0.10.0
libtpu: 0.0.40
codegen_flags: <defaults>
</compile_context>

<pallas_src>
import jax
import jax.numpy as jnp
from jax import lax
from jax.experimental import pallas as pl
from jax.experimental.pallas import tpu as pltpu

# ---- model dims (GAT/GCN hidden sizes are hardcoded in the PyTorch module) ----
IN_SIZE = 16            # node feature dim (in_size global)
OUT_SIZE = 8            # GAT / GCN output dim (out_size global)
GAT_HID, GAT_HID_P = 100, 128
GAT_HEADS = (5, 1)
GCN_HID1, GCN_HID1_P = 300, 384
GCN_HID2, GCN_HID2_P = 100, 128
IN_DIM = 2 * OUT_SIZE   # fc1 input = cat(x_gat, x_gcn)
HMONET_DIM, HMONET_P = 32, 128
OUT_DIM, OUT_P = 8, 128
N_NODES = 8


def _leaky_relu(x, slope):
    return jnp.where(x > 0, x, slope * x)


def _elu(x):
    return jnp.where(x > 0, x, jnp.exp(x) - 1.0)


def monet_kernel(a_ref, x_ref,
                 g0_w, g0_rw, g0_alp, g0_arp, g0_b,
                 g1_w, g1_rw, g1_attn, g1_b,
                 c0_w, c0_b, c1_w, c1_b, c2_w, c2_b,
                 f1_wa, f1_wb, f1_b, f2_w, f2_b,
                 out_ref):
    A = a_ref[...]                                # (N, N) f32 dense adjacency
    X = x_ref[...]                                # (N, IN_SIZE) f32
    Xb = X.astype(jnp.bfloat16)

    # Edge mask, hoisted once and reused by all attention heads.
    mask = A > 0.0
    mask_f = mask.astype(jnp.float32)
    neg_big = jnp.float32(-1e30)

    def edge_softmax(er, el_t):
        # er: (N, 1) dst score, el_t: (1, N) src score -> alpha (N, N)
        e = _leaky_relu(er + el_t, 0.2)
        e = jnp.where(mask, e, neg_big)
        e = e - jnp.max(e, axis=1, keepdims=True)
        p = jnp.exp(e) * mask_f                   # single fused mask
        denom = jnp.maximum(jnp.sum(p, axis=1, keepdims=True), 1e-20)
        return p * pl.reciprocal(denom, approx=True)

    # ----------------- GAT layer 0 (5 heads, ELU, residual) -----------------
    # TODO(synk): feat_drop / attn_drop / nn.Dropout are eval-mode identities.
    EL0 = jnp.dot(Xb, g0_alp[...], preferred_element_type=jnp.float32)   # (N, 8)
    ER0 = jnp.dot(Xb, g0_arp[...], preferred_element_type=jnp.float32)   # (N, 8)

    # Layer-1 input projection accumulated per head (never build (N, 500)).
    feat1 = jnp.zeros((N_NODES, OUT_SIZE), jnp.float32)
    res1 = jnp.zeros((N_NODES, OUT_SIZE), jnp.float32)
    for j in range(GAT_HEADS[0]):                  # static unroll over heads
        fj = jnp.dot(Xb, g0_w[j], preferred_element_type=jnp.float32)    # (N, 128)
        rj = jnp.dot(Xb, g0_rw[j], preferred_element_type=jnp.float32)   # residual
        alpha = edge_softmax(ER0[:, j:j + 1], EL0[:, j:j + 1].T)
        oj = jnp.dot(alpha.astype(jnp.bfloat16), fj.astype(jnp.bfloat16),
                     preferred_element_type=jnp.float32)
        oj = _elu(oj + rj + g0_b[j])                                     # (N, 128)
        ojb = oj.astype(jnp.bfloat16)
        feat1 = feat1 + jnp.dot(ojb, g1_w[j], preferred_element_type=jnp.float32)
        res1 = res1 + jnp.dot(ojb, g1_rw[j], preferred_element_type=jnp.float32)

    # --------------- GAT layer 1 (1 head, residual, mean == identity) -------
    feat1b = feat1.astype(jnp.bfloat16)
    scores = jnp.dot(feat1b, g1_attn[...], preferred_element_type=jnp.float32)  # (N,2)
    alpha1 = edge_softmax(scores[:, 1:2], scores[:, 0:1].T)
    x_gat = (jnp.dot(alpha1.astype(jnp.bfloat16), feat1b,
                     preferred_element_type=jnp.float32)
             + res1 + g1_b[...])                                         # (N, OUT)

    # ------------------------------ GCN branch ------------------------------
    in_deg = jnp.sum(A, axis=1, keepdims=True)     # (N, 1) dst in-degree
    out_deg = jnp.sum(A, axis=0, keepdims=True)    # (1, N) src out-degree
    norm_dst = lax.rsqrt(jnp.maximum(in_deg, 1.0))
    norm_src = lax.rsqrt(jnp.maximum(out_deg, 1.0))
    a_norm = (A * norm_src).astype(jnp.bfloat16)   # cols scaled by D_src^-1/2

    def gcn_layer(h, w_ref, b_ref, act):
        hw = jnp.dot(h.astype(jnp.bfloat16), w_ref[...],
                     preferred_element_type=jnp.float32)
        agg = jnp.dot(a_norm, hw.astype(jnp.bfloat16),
                      preferred_element_type=jnp.float32)
        o = agg * norm_dst + b_ref[...]
        if act:
            o = jnp.maximum(o, 0.0)
        return o

    h = gcn_layer(X, c0_w, c0_b, True)             # (N, 384)
    h = gcn_layer(h, c1_w, c1_b, True)             # (N, 128)
    x_gcn = gcn_layer(h, c2_w, c2_b, False)        # (N, OUT_SIZE)
    # TODO(synk): GCN nn.Dropout(0.25) is an eval-mode identity.

    # ------------------------------ MONet head ------------------------------
    # cat(x_gat, x_gcn) @ fc1.W == x_gat @ fc1.W[:8] + x_gcn @ fc1.W[8:]
    z = (jnp.dot(x_gat.astype(jnp.bfloat16), f1_wa[...],
                 preferred_element_type=jnp.float32)
         + jnp.dot(x_gcn.astype(jnp.bfloat16), f1_wb[...],
                   preferred_element_type=jnp.float32)
         + f1_b[...])
    z = _leaky_relu(z, 0.25)                       # LeakyReLU(0.25); dropout = id
    out = jnp.dot(z.astype(jnp.bfloat16), f2_w[...],
                  preferred_element_type=jnp.float32) + f2_b[...]
    out_ref[...] = out                             # (N, 128) lane-dense slab


def monet_forward(A, X, kernel_params):
    vmem = pl.BlockSpec(memory_space=pltpu.MemorySpace.VMEM)
    n_in = 2 + len(kernel_params)
    out = pl.pallas_call(
        monet_kernel,
        out_shape=jax.ShapeDtypeStruct((X.shape[0], OUT_P), jnp.float32),
        in_specs=[vmem] * n_in,
        out_specs=vmem,
    )(A, X, *kernel_params)
    return out[:, :OUT_DIM]                        # drop lane padding


def init_raw_params(key):
    """PyTorch-layout parameters (weights stored as (in_features, out_features))."""
    def nrm(k, shape, scale=0.1):
        return scale * jax.random.normal(k, shape, dtype=jnp.float32)

    ks = jax.random.split(key, 20)
    h0, h1 = GAT_HEADS
    return [
        # GAT layer 0: GATConv(IN_SIZE, GAT_HID, heads=5, residual=True)
        nrm(ks[0], (IN_SIZE, h0 * GAT_HID)),       # fc weight
        nrm(ks[1], (h0, GAT_HID)),                 # attn_l
        nrm(ks[2], (h0, GAT_HID)),                 # attn_r
        nrm(ks[3], (IN_SIZE, h0 * GAT_HID)),       # residual fc weight
        nrm(ks[4], (1, h0 * GAT_HID)),             # bias
        # GAT layer 1: GATConv(5*GAT_HID, OUT_SIZE, heads=1, residual=True)
        nrm(ks[5], (h0 * GAT_HID, h1 * OUT_SIZE)),
        nrm(ks[6], (h1, OUT_SIZE)),
        nrm(ks[7], (h1, OUT_SIZE)),
        nrm(ks[8], (h0 * GAT_HID, h1 * OUT_SIZE)),
        nrm(ks[9], (1, h1 * OUT_SIZE)),
        # GCN: GraphConv(IN,300) -> GraphConv(300,100) -> GraphConv(100,OUT)
        nrm(ks[10], (IN_SIZE, GCN_HID1)), nrm(ks[11], (1, GCN_HID1)),
        nrm(ks[12], (GCN_HID1, GCN_HID2)), nrm(ks[13], (1, GCN_HID2)),
        nrm(ks[14], (GCN_HID2, OUT_SIZE)), nrm(ks[15], (1, OUT_SIZE)),
        # MONet head: fc1(IN_DIM, HMONET_DIM), fc2(HMONET_DIM, OUT_DIM)
        nrm(ks[16], (IN_DIM, HMONET_DIM)), nrm(ks[17], (1, HMONET_DIM)),
        nrm(ks[18], (HMONET_DIM, OUT_DIM)), nrm(ks[19], (1, OUT_DIM)),
    ]


def _pad_to(x, shape):
    return jnp.pad(x, [(0, t - s) for s, t in zip(x.shape, shape)])


def prepare_params(raw):
    """Repack raw params into the kernel layout: head-major GAT weights, folded
    attention projections, split fc1, lane dims zero-padded to multiples of
    128, matmul operands cast to bf16 (zero padding keeps numerics unchanged)."""
    (g0_w, g0_al, g0_ar, g0_rw, g0_b,
     g1_w, g1_al, g1_ar, g1_rw, g1_b,
     c0_w, c0_b, c1_w, c1_b, c2_w, c2_b,
     f1_w, f1_b, f2_w, f2_b) = raw
    h0 = GAT_HEADS[0]
    bf, f32 = jnp.bfloat16, jnp.float32

    w0 = g0_w.reshape(IN_SIZE, h0, GAT_HID)        # (16, 5, 100), head-major cols
    r0 = g0_rw.reshape(IN_SIZE, h0, GAT_HID)
    # attention vectors folded into the fc weight: el = X @ al_proj, (IN, heads)
    al_proj = jnp.einsum('ihf,hf->ih', w0, g0_al)
    ar_proj = jnp.einsum('ihf,hf->ih', w0, g0_ar)

    return [
        _pad_to(w0.transpose(1, 0, 2), (h0, IN_SIZE, GAT_HID_P)).astype(bf),
        _pad_to(r0.transpose(1, 0, 2), (h0, IN_SIZE, GAT_HID_P)).astype(bf),
        _pad_to(al_proj, (IN_SIZE, 8)).astype(bf),
        _pad_to(ar_proj, (IN_SIZE, 8)).astype(bf),
        _pad_to(g0_b.reshape(h0, 1, GAT_HID), (h0, 1, GAT_HID_P)).astype(f32),
        _pad_to(g1_w.reshape(h0, GAT_HID, OUT_SIZE),
                (h0, GAT_HID_P, OUT_SIZE)).astype(bf),
        _pad_to(g1_rw.reshape(h0, GAT_HID, OUT_SIZE),
                (h0, GAT_HID_P, OUT_SIZE)).astype(bf),
        jnp.concatenate([g1_al.reshape(OUT_SIZE, 1),      # col 0: attn_l
                         g1_ar.reshape(OUT_SIZE, 1)], axis=1).astype(bf),
        g1_b.astype(f32),
        _pad_to(c0_w, (IN_SIZE, GCN_HID1_P)).astype(bf),
        _pad_to(c0_b, (1, GCN_HID1_P)).astype(f32),
        _pad_to(c1_w, (GCN_HID1_P, GCN_HID2_P)).astype(bf),
        _pad_to(c1_b, (1, GCN_HID2_P)).astype(f32),
        _pad_to(c2_w, (GCN_HID2_P, OUT_SIZE)).astype(bf),
        c2_b.astype(f32),
        _pad_to(f1_w[:OUT_SIZE, :], (OUT_SIZE, HMONET_P)).astype(bf),   # x_gat half
        _pad_to(f1_w[OUT_SIZE:, :], (OUT_SIZE, HMONET_P)).astype(bf),   # x_gcn half
        _pad_to(f1_b, (1, HMONET_P)).astype(f32),
        _pad_to(f2_w, (HMONET_P, OUT_P)).astype(bf),
        _pad_to(f2_b, (1, OUT_P)).astype(f32),
    ]


if __name__ == "__main__":
    key = jax.random.PRNGKey(0)
    k_adj, k_x, k_p = jax.random.split(key, 3)

    # small random undirected graph with self-loops (every node has >=1 in-edge)
    bern = jax.random.bernoulli(k_adj, 0.4, (N_NODES, N_NODES))
    adj = jnp.logical_or(bern, bern.T)
    adj = jnp.logical_or(adj, jnp.eye(N_NODES, dtype=bool))
    A = adj.astype(jnp.float32)

    X = jax.random.normal(k_x, (N_NODES, IN_SIZE), dtype=jnp.float32)
    params = prepare_params(init_raw_params(k_p))

    out = monet_forward(A, X, params)
    out = jax.block_until_ready(out)
    assert out.shape == (N_NODES, OUT_DIM)
    assert bool(jnp.all(jnp.isfinite(out)))
    print("KERNEL_OK")
</pallas_src>

<mosaic_0001>
module attributes {stable_mosaic.version = 11 : i64} {
  func.func @monet_kernel(%arg0: memref<8x8xf32, #tpu.memory_space<vmem>>, %arg1: memref<8x16xf32, #tpu.memory_space<vmem>>, %arg2: memref<5x16x128xbf16, #tpu.memory_space<vmem>>, %arg3: memref<5x16x128xbf16, #tpu.memory_space<vmem>>, %arg4: memref<16x8xbf16, #tpu.memory_space<vmem>>, %arg5: memref<16x8xbf16, #tpu.memory_space<vmem>>, %arg6: memref<5x1x128xf32, #tpu.memory_space<vmem>>, %arg7: memref<5x128x8xbf16, #tpu.memory_space<vmem>>, %arg8: memref<5x128x8xbf16, #tpu.memory_space<vmem>>, %arg9: memref<8x2xbf16, #tpu.memory_space<vmem>>, %arg10: memref<1x8xf32, #tpu.memory_space<vmem>>, %arg11: memref<16x384xbf16, #tpu.memory_space<vmem>>, %arg12: memref<1x384xf32, #tpu.memory_space<vmem>>, %arg13: memref<384x128xbf16, #tpu.memory_space<vmem>>, %arg14: memref<1x128xf32, #tpu.memory_space<vmem>>, %arg15: memref<128x8xbf16, #tpu.memory_space<vmem>>, %arg16: memref<1x8xf32, #tpu.memory_space<vmem>>, %arg17: memref<8x128xbf16, #tpu.memory_space<vmem>>, %arg18: memref<8x128xbf16, #tpu.memory_space<vmem>>, %arg19: memref<1x128xf32, #tpu.memory_space<vmem>>, %arg20: memref<128x128xbf16, #tpu.memory_space<vmem>>, %arg21: memref<1x128xf32, #tpu.memory_space<vmem>>, %arg22: memref<8x128xf32, #tpu.memory_space<vmem>>) attributes {dimension_semantics = [], scalar_prefetch = 0 : i64, scratch_operands = 0 : i64, tpu.core_type = #tpu.core_type<tc>} {
    %c0 = arith.constant 0 : index
    %c0_0 = arith.constant 0 : index
    %0 = vector.load %arg0[%c0, %c0_0] : memref<8x8xf32, #tpu.memory_space<vmem>>, vector<8x8xf32>
    %c0_1 = arith.constant 0 : index
    %c0_2 = arith.constant 0 : index
    %1 = vector.load %arg1[%c0_1, %c0_2] : memref<8x16xf32, #tpu.memory_space<vmem>>, vector<8x16xf32>
    %2 = arith.truncf %1 : vector<8x16xf32> to vector<8x16xbf16>
    %cst = arith.constant 0.000000e+00 : f32
    %3 = vector.broadcast %cst : f32 to vector<8x8xf32>
    %4 = arith.cmpf ogt, %0, %3 : vector<8x8xf32>
    %5 = arith.extui %4 : vector<8x8xi1> to vector<8x8xi32>
    %6 = arith.sitofp %5 : vector<8x8xi32> to vector<8x8xf32>
    %c0_3 = arith.constant 0 : index
    %c0_4 = arith.constant 0 : index
    %7 = vector.load %arg4[%c0_3, %c0_4] : memref<16x8xbf16, #tpu.memory_space<vmem>>, vector<16x8xbf16>
    %cst_5 = arith.constant dense<0.000000e+00> : vector<8x8xf32>
    %8 = tpu.matmul %2, %7, %cst_5 {dimension_numbers = #tpu.dot_dimension_numbers<[1], [0], [0], [1], [0, 0, 1, 1], [], []>} : vector<8x16xbf16>, vector<16x8xbf16>, vector<8x8xf32> -> vector<8x8xf32>
    %c0_6 = arith.constant 0 : index
    %c0_7 = arith.constant 0 : index
    %9 = vector.load %arg5[%c0_6, %c0_7] : memref<16x8xbf16, #tpu.memory_space<vmem>>, vector<16x8xbf16>
    %cst_8 = arith.constant dense<0.000000e+00> : vector<8x8xf32>
    %10 = tpu.matmul %2, %9, %cst_8 {dimension_numbers = #tpu.dot_dimension_numbers<[1], [0], [0], [1], [0, 0, 1, 1], [], []>} : vector<8x16xbf16>, vector<16x8xbf16>, vector<8x8xf32> -> vector<8x8xf32>
    %cst_9 = arith.constant 0.000000e+00 : f32
    %11 = vector.broadcast %cst_9 : f32 to vector<8x8xf32>
    %cst_10 = arith.constant 0.000000e+00 : f32
    %12 = vector.broadcast %cst_10 : f32 to vector<8x8xf32>
    %c0_11 = arith.constant 0 : index
    %c0_12 = arith.constant 0 : index
    %c0_13 = arith.constant 0 : index
    %13 = vector.load %arg2[%c0_11, %c0_12, %c0_13] : memref<5x16x128xbf16, #tpu.memory_space<vmem>>, vector<1x16x128xbf16>
    %14 = vector.shape_cast %13 : vector<1x16x128xbf16> to vector<16x128xbf16>
    %cst_14 = arith.constant dense<0.000000e+00> : vector<8x128xf32>
    %15 = tpu.matmul %2, %14, %cst_14 {dimension_numbers = #tpu.dot_dimension_numbers<[1], [0], [0], [1], [0, 0, 1, 1], [], []>} : vector<8x16xbf16>, vector<16x128xbf16>, vector<8x128xf32> -> vector<8x128xf32>
    %c0_15 = arith.constant 0 : index
    %c0_16 = arith.constant 0 : index
    %c0_17 = arith.constant 0 : index
    %16 = vector.load %arg3[%c0_15, %c0_16, %c0_17] : memref<5x16x128xbf16, #tpu.memory_space<vmem>>, vector<1x16x128xbf16>
    %17 = vector.shape_cast %16 : vector<1x16x128xbf16> to vector<16x128xbf16>
    %cst_18 = arith.constant dense<0.000000e+00> : vector<8x128xf32>
    %18 = tpu.matmul %2, %17, %cst_18 {dimension_numbers = #tpu.dot_dimension_numbers<[1], [0], [0], [1], [0, 0, 1, 1], [], []>} : vector<8x16xbf16>, vector<16x128xbf16>, vector<8x128xf32> -> vector<8x128xf32>
    %19 = vector.extract_strided_slice %10 {offsets = [0, 0], sizes = [8, 1], strides = [1, 1]} : vector<8x8xf32> to vector<8x1xf32>
    %20 = vector.extract_strided_slice %8 {offsets = [0, 0], sizes = [8, 1], strides = [1, 1]} : vector<8x8xf32> to vector<8x1xf32>
    %21 = tpu.transpose %20, [1, 0] : vector<8x1xf32> -> vector<1x8xf32>
    %22 = vector.broadcast %19 : vector<8x1xf32> to vector<8x8xf32>
    %23 = vector.broadcast %21 : vector<1x8xf32> to vector<8x8xf32>
    %24 = arith.addf %22, %23 : vector<8x8xf32>
    %cst_19 = arith.constant 0.000000e+00 : f32
    %25 = vector.broadcast %cst_19 : f32 to vector<8x8xf32>
    %26 = arith.cmpf ogt, %24, %25 : vector<8x8xf32>
    %cst_20 = arith.constant 2.000000e-01 : f32
    %27 = vector.broadcast %cst_20 : f32 to vector<8x8xf32>
    %28 = arith.mulf %27, %24 : vector<8x8xf32>
    %29 = arith.select %26, %24, %28 : vector<8x8xi1>, vector<8x8xf32>
    %cst_21 = arith.constant -1.000000e+30 : f32
    %30 = vector.broadcast %cst_21 : f32 to vector<8x8xf32>
    %31 = arith.select %4, %29, %30 : vector<8x8xi1>, vector<8x8xf32>
    %cst_22 = arith.constant dense<0xFF800000> : vector<8xf32>
    %32 = vector.multi_reduction <maximumf>, %31, %cst_22 [1] : vector<8x8xf32> to vector<8xf32>
    %33 = vector.shape_cast %32 : vector<8xf32> to vector<8x1xf32>
    %34 = vector.broadcast %33 : vector<8x1xf32> to vector<8x8xf32>
    %35 = arith.subf %31, %34 : vector<8x8xf32>
    %36 = math.exp %35 : vector<8x8xf32>
    %37 = arith.mulf %36, %6 : vector<8x8xf32>
    %cst_23 = arith.constant dense<0.000000e+00> : vector<8xf32>
    %38 = vector.multi_reduction <add>, %37, %cst_23 [1] : vector<8x8xf32> to vector<8xf32>
    %39 = vector.shape_cast %38 : vector<8xf32> to vector<8x1xf32>
    %cst_24 = arith.constant 9.99999968E-21 : f32
    %40 = vector.broadcast %cst_24 : f32 to vector<8x1xf32>
    %41 = arith.maximumf %39, %40 : vector<8x1xf32>
    %42 = tpu.reciprocal %41 {approx = true} : vector<8x1xf32> -> vector<8x1xf32>
    %43 = vector.broadcast %42 : vector<8x1xf32> to vector<8x8xf32>
    %44 = arith.mulf %37, %43 : vector<8x8xf32>
    %45 = arith.truncf %44 : vector<8x8xf32> to vector<8x8xbf16>
    %46 = arith.truncf %15 : vector<8x128xf32> to vector<8x128xbf16>
    %cst_25 = arith.constant dense<0.000000e+00> : vector<8x128xf32>
    %47 = tpu.matmul %45, %46, %cst_25 {dimension_numbers = #tpu.dot_dimension_numbers<[1], [0], [0], [1], [0, 0, 1, 1], [], []>} : vector<8x8xbf16>, vector<8x128xbf16>, vector<8x128xf32> -> vector<8x128xf32>
    %48 = arith.addf %47, %18 : vector<8x128xf32>
    %c0_26 = arith.constant 0 : index
    %c0_27 = arith.constant 0 : index
    %c0_28 = arith.constant 0 : index
    %49 = vector.load %arg6[%c0_26, %c0_27, %c0_28] : memref<5x1x128xf32, #tpu.memory_space<vmem>>, vector<1x1x128xf32>
    %50 = vector.shape_cast %49 : vector<1x1x128xf32> to vector<1x128xf32>
    %51 = vector.broadcast %50 : vector<1x128xf32> to vector<8x128xf32>
    %52 = arith.addf %48, %51 : vector<8x128xf32>
    %cst_29 = arith.constant 0.000000e+00 : f32
    %53 = vector.broadcast %cst_29 : f32 to vector<8x128xf32>
    %54 = arith.cmpf ogt, %52, %53 : vector<8x128xf32>
    %55 = math.exp %52 : vector<8x128xf32>
    %cst_30 = arith.constant 1.000000e+00 : f32
    %56 = vector.broadcast %cst_30 : f32 to vector<8x128xf32>
    %57 = arith.subf %55, %56 : vector<8x128xf32>
    %58 = arith.select %54, %52, %57 : vector<8x128xi1>, vector<8x128xf32>
    %59 = arith.truncf %58 : vector<8x128xf32> to vector<8x128xbf16>
    %c0_31 = arith.constant 0 : index
    %c0_32 = arith.constant 0 : index
    %c0_33 = arith.constant 0 : index
    %60 = vector.load %arg7[%c0_31, %c0_32, %c0_33] : memref<5x128x8xbf16, #tpu.memory_space<vmem>>, vector<1x128x8xbf16>
    %61 = vector.shape_cast %60 : vector<1x128x8xbf16> to vector<128x8xbf16>
    %cst_34 = arith.constant dense<0.000000e+00> : vector<8x8xf32>
    %62 = tpu.matmul %59, %61, %cst_34 {dimension_numbers = #tpu.dot_dimension_numbers<[1], [0], [0], [1], [0, 0, 1, 1], [], []>} : vector<8x128xbf16>, vector<128x8xbf16>, vector<8x8xf32> -> vector<8x8xf32>
    %63 = arith.addf %11, %62 : vector<8x8xf32>
    %c0_35 = arith.constant 0 : index
    %c0_36 = arith.constant 0 : index
    %c0_37 = arith.constant 0 : index
    %64 = vector.load %arg8[%c0_35, %c0_36, %c0_37] : memref<5x128x8xbf16, #tpu.memory_space<vmem>>, vector<1x128x8xbf16>
    %65 = vector.shape_cast %64 : vector<1x128x8xbf16> to vector<128x8xbf16>
    %cst_38 = arith.constant dense<0.000000e+00> : vector<8x8xf32>
    %66 = tpu.matmul %59, %65, %cst_38 {dimension_numbers = #tpu.dot_dimension_numbers<[1], [0], [0], [1], [0, 0, 1, 1], [], []>} : vector<8x128xbf16>, vector<128x8xbf16>, vector<8x8xf32> -> vector<8x8xf32>
    %67 = arith.addf %12, %66 : vector<8x8xf32>
    %c1 = arith.constant 1 : index
    %c0_39 = arith.constant 0 : index
    %c0_40 = arith.constant 0 : index
    %68 = vector.load %arg2[%c1, %c0_39, %c0_40] : memref<5x16x128xbf16, #tpu.memory_space<vmem>>, vector<1x16x128xbf16>
    %69 = vector.shape_cast %68 : vector<1x16x128xbf16> to vector<16x128xbf16>
    %cst_41 = arith.constant dense<0.000000e+00> : vector<8x128xf32>
    %70 = tpu.matmul %2, %69, %cst_41 {dimension_numbers = #tpu.dot_dimension_numbers<[1], [0], [0], [1], [0, 0, 1, 1], [], []>} : vector<8x16xbf16>, vector<16x128xbf16>, vector<8x128xf32> -> vector<8x128xf32>
    %c1_42 = arith.constant 1 : index
    %c0_43 = arith.constant 0 : index
    %c0_44 = arith.constant 0 : index
    %71 = vector.load %arg3[%c1_42, %c0_43, %c0_44] : memref<5x16x128xbf16, #tpu.memory_space<vmem>>, vector<1x16x128xbf16>
    %72 = vector.shape_cast %71 : vector<1x16x128xbf16> to vector<16x128xbf16>
    %cst_45 = arith.constant dense<0.000000e+00> : vector<8x128xf32>
    %73 = tpu.matmul %2, %72, %cst_45 {dimension_numbers = #tpu.dot_dimension_numbers<[1], [0], [0], [1], [0, 0, 1, 1], [], []>} : vector<8x16xbf16>, vector<16x128xbf16>, vector<8x128xf32> -> vector<8x128xf32>
    %74 = vector.extract_strided_slice %10 {offsets = [0, 1], sizes = [8, 1], strides = [1, 1]} : vector<8x8xf32> to vector<8x1xf32>
    %75 = vector.extract_strided_slice %8 {offsets = [0, 1], sizes = [8, 1], strides = [1, 1]} : vector<8x8xf32> to vector<8x1xf32>
    %76 = tpu.transpose %75, [1, 0] : vector<8x1xf32> -> vector<1x8xf32>
    %77 = vector.broadcast %74 : vector<8x1xf32> to vector<8x8xf32>
    %78 = vector.broadcast %76 : vector<1x8xf32> to vector<8x8xf32>
    %79 = arith.addf %77, %78 : vector<8x8xf32>
    %cst_46 = arith.constant 0.000000e+00 : f32
    %80 = vector.broadcast %cst_46 : f32 to vector<8x8xf32>
    %81 = arith.cmpf ogt, %79, %80 : vector<8x8xf32>
    %cst_47 = arith.constant 2.000000e-01 : f32
    %82 = vector.broadcast %cst_47 : f32 to vector<8x8xf32>
    %83 = arith.mulf %82, %79 : vector<8x8xf32>
    %84 = arith.select %81, %79, %83 : vector<8x8xi1>, vector<8x8xf32>
    %cst_48 = arith.constant -1.000000e+30 : f32
    %85 = vector.broadcast %cst_48 : f32 to vector<8x8xf32>
    %86 = arith.select %4, %84, %85 : vector<8x8xi1>, vector<8x8xf32>
    %cst_49 = arith.constant dense<0xFF800000> : vector<8xf32>
    %87 = vector.multi_reduction <maximumf>, %86, %cst_49 [1] : vector<8x8xf32> to vector<8xf32>
    %88 = vector.shape_cast %87 : vector<8xf32> to vector<8x1xf32>
    %89 = vector.broadcast %88 : vector<8x1xf32> to vector<8x8xf32>
    %90 = arith.subf %86, %89 : vector<8x8xf32>
    %91 = math.exp %90 : vector<8x8xf32>
    %92 = arith.mulf %91, %6 : vector<8x8xf32>
    %cst_50 = arith.constant dense<0.000000e+00> : vector<8xf32>
    %93 = vector.multi_reduction <add>, %92, %cst_50 [1] : vector<8x8xf32> to vector<8xf32>
    %94 = vector.shape_cast %93 : vector<8xf32> to vector<8x1xf32>
    %cst_51 = arith.constant 9.99999968E-21 : f32
    %95 = vector.broadcast %cst_51 : f32 to vector<8x1xf32>
    %96 = arith.maximumf %94, %95 : vector<8x1xf32>
    %97 = tpu.reciprocal %96 {approx = true} : vector<8x1xf32> -> vector<8x1xf32>
    %98 = vector.broadcast %97 : vector<8x1xf32> to vector<8x8xf32>
    %99 = arith.mulf %92, %98 : vector<8x8xf32>
    %100 = arith.truncf %99 : vector<8x8xf32> to vector<8x8xbf16>
    %101 = arith.truncf %70 : vector<8x128xf32> to vector<8x128xbf16>
    %cst_52 = arith.constant dense<0.000000e+00> : vector<8x128xf32>
    %102 = tpu.matmul %100, %101, %cst_52 {dimension_numbers = #tpu.dot_dimension_numbers<[1], [0], [0], [1], [0, 0, 1, 1], [], []>} : vector<8x8xbf16>, vector<8x128xbf16>, vector<8x128xf32> -> vector<8x128xf32>
    %103 = arith.addf %102, %73 : vector<8x128xf32>
    %c1_53 = arith.constant 1 : index
    %c0_54 = arith.constant 0 : index
    %c0_55 = arith.constant 0 : index
    %104 = vector.load %arg6[%c1_53, %c0_54, %c0_55] : memref<5x1x128xf32, #tpu.memory_space<vmem>>, vector<1x1x128xf32>
    %105 = vector.shape_cast %104 : vector<1x1x128xf32> to vector<1x128xf32>
    %106 = vector.broadcast %105 : vector<1x128xf32> to vector<8x128xf32>
    %107 = arith.addf %103, %106 : vector<8x128xf32>
    %cst_56 = arith.constant 0.000000e+00 : f32
    %108 = vector.broadcast %cst_56 : f32 to vector<8x128xf32>
    %109 = arith.cmpf ogt, %107, %108 : vector<8x128xf32>
    %110 = math.exp %107 : vector<8x128xf32>
    %cst_57 = arith.constant 1.000000e+00 : f32
    %111 = vector.broadcast %cst_57 : f32 to vector<8x128xf32>
    %112 = arith.subf %110, %111 : vector<8x128xf32>
    %113 = arith.select %109, %107, %112 : vector<8x128xi1>, vector<8x128xf32>
    %114 = arith.truncf %113 : vector<8x128xf32> to vector<8x128xbf16>
    %c1_58 = arith.constant 1 : index
    %c0_59 = arith.constant 0 : index
    %c0_60 = arith.constant 0 : index
    %115 = vector.load %arg7[%c1_58, %c0_59, %c0_60] : memref<5x128x8xbf16, #tpu.memory_space<vmem>>, vector<1x128x8xbf16>
    %116 = vector.shape_cast %115 : vector<1x128x8xbf16> to vector<128x8xbf16>
    %cst_61 = arith.constant dense<0.000000e+00> : vector<8x8xf32>
    %117 = tpu.matmul %114, %116, %cst_61 {dimension_numbers = #tpu.dot_dimension_numbers<[1], [0], [0], [1], [0, 0, 1, 1], [], []>} : vector<8x128xbf16>, vector<128x8xbf16>, vector<8x8xf32> -> vector<8x8xf32>
    %118 = arith.addf %63, %117 : vector<8x8xf32>
    %c1_62 = arith.constant 1 : index
    %c0_63 = arith.constant 0 : index
    %c0_64 = arith.constant 0 : index
    %119 = vector.load %arg8[%c1_62, %c0_63, %c0_64] : memref<5x128x8xbf16, #tpu.memory_space<vmem>>, vector<1x128x8xbf16>
    %120 = vector.shape_cast %119 : vector<1x128x8xbf16> to vector<128x8xbf16>
    %cst_65 = arith.constant dense<0.000000e+00> : vector<8x8xf32>
    %121 = tpu.matmul %114, %120, %cst_65 {dimension_numbers = #tpu.dot_dimension_numbers<[1], [0], [0], [1], [0, 0, 1, 1], [], []>} : vector<8x128xbf16>, vector<128x8xbf16>, vector<8x8xf32> -> vector<8x8xf32>
    %122 = arith.addf %67, %121 : vector<8x8xf32>
    %c2 = arith.constant 2 : index
    %c0_66 = arith.constant 0 : index
    %c0_67 = arith.constant 0 : index
    %123 = vector.load %arg2[%c2, %c0_66, %c0_67] : memref<5x16x128xbf16, #tpu.memory_space<vmem>>, vector<1x16x128xbf16>
    %124 = vector.shape_cast %123 : vector<1x16x128xbf16> to vector<16x128xbf16>
    %cst_68 = arith.constant dense<0.000000e+00> : vector<8x128xf32>
    %125 = tpu.matmul %2, %124, %cst_68 {dimension_numbers = #tpu.dot_dimension_numbers<[1], [0], [0], [1], [0, 0, 1, 1], [], []>} : vector<8x16xbf16>, vector<16x128xbf16>, vector<8x128xf32> -> vector<8x128xf32>
    %c2_69 = arith.constant 2 : index
    %c0_70 = arith.constant 0 : index
    %c0_71 = arith.constant 0 : index
    %126 = vector.load %arg3[%c2_69, %c0_70, %c0_71] : memref<5x16x128xbf16, #tpu.memory_space<vmem>>, vector<1x16x128xbf16>
    %127 = vector.shape_cast %126 : vector<1x16x128xbf16> to vector<16x128xbf16>
    %cst_72 = arith.constant dense<0.000000e+00> : vector<8x128xf32>
    %128 = tpu.matmul %2, %127, %cst_72 {dimension_numbers = #tpu.dot_dimension_numbers<[1], [0], [0], [1], [0, 0, 1, 1], [], []>} : vector<8x16xbf16>, vector<16x128xbf16>, vector<8x128xf32> -> vector<8x128xf32>
    %129 = vector.extract_strided_slice %10 {offsets = [0, 2], sizes = [8, 1], strides = [1, 1]} : vector<8x8xf32> to vector<8x1xf32>
    %130 = vector.extract_strided_slice %8 {offsets = [0, 2], sizes = [8, 1], strides = [1, 1]} : vector<8x8xf32> to vector<8x1xf32>
    %131 = tpu.transpose %130, [1, 0] : vector<8x1xf32> -> vector<1x8xf32>
    %132 = vector.broadcast %129 : vector<8x1xf32> to vector<8x8xf32>
    %133 = vector.broadcast %131 : vector<1x8xf32> to vector<8x8xf32>
    %134 = arith.addf %132, %133 : vector<8x8xf32>
    %cst_73 = arith.constant 0.000000e+00 : f32
    %135 = vector.broadcast %cst_73 : f32 to vector<8x8xf32>
    %136 = arith.cmpf ogt, %134, %135 : vector<8x8xf32>
    %cst_74 = arith.constant 2.000000e-01 : f32
    %137 = vector.broadcast %cst_74 : f32 to vector<8x8xf32>
    %138 = arith.mulf %137, %134 : vector<8x8xf32>
    %139 = arith.select %136, %134, %138 : vector<8x8xi1>, vector<8x8xf32>
    %cst_75 = arith.constant -1.000000e+30 : f32
    %140 = vector.broadcast %cst_75 : f32 to vector<8x8xf32>
    %141 = arith.select %4, %139, %140 : vector<8x8xi1>, vector<8x8xf32>
    %cst_76 = arith.constant dense<0xFF800000> : vector<8xf32>
    %142 = vector.multi_reduction <maximumf>, %141, %cst_76 [1] : vector<8x8xf32> to vector<8xf32>
    %143 = vector.shape_cast %142 : vector<8xf32> to vector<8x1xf32>
    %144 = vector.broadcast %143 : vector<8x1xf32> to vector<8x8xf32>
    %145 = arith.subf %141, %144 : vector<8x8xf32>
    %146 = math.exp %145 : vector<8x8xf32>
    %147 = arith.mulf %146, %6 : vector<8x8xf32>
    %cst_77 = arith.constant dense<0.000000e+00> : vector<8xf32>
    %148 = vector.multi_reduction <add>, %147, %cst_77 [1] : vector<8x8xf32> to vector<8xf32>
    %149 = vector.shape_cast %148 : vector<8xf32> to vector<8x1xf32>
    %cst_78 = arith.constant 9.99999968E-21 : f32
    %150 = vector.broadcast %cst_78 : f32 to vector<8x1xf32>
    %151 = arith.maximumf %149, %150 : vector<8x1xf32>
    %152 = tpu.reciprocal %151 {approx = true} : vector<8x1xf32> -> vector<8x1xf32>
    %153 = vector.broadcast %152 : vector<8x1xf32> to vector<8x8xf32>
    %154 = arith.mulf %147, %153 : vector<8x8xf32>
    %155 = arith.truncf %154 : vector<8x8xf32> to vector<8x8xbf16>
    %156 = arith.truncf %125 : vector<8x128xf32> to vector<8x128xbf16>
    %cst_79 = arith.constant dense<0.000000e+00> : vector<8x128xf32>
    %157 = tpu.matmul %155, %156, %cst_79 {dimension_numbers = #tpu.dot_dimension_numbers<[1], [0], [0], [1], [0, 0, 1, 1], [], []>} : vector<8x8xbf16>, vector<8x128xbf16>, vector<8x128xf32> -> vector<8x128xf32>
    %158 = arith.addf %157, %128 : vector<8x128xf32>
    %c2_80 = arith.constant 2 : index
    %c0_81 = arith.constant 0 : index
    %c0_82 = arith.constant 0 : index
    %159 = vector.load %arg6[%c2_80, %c0_81, %c0_82] : memref<5x1x128xf32, #tpu.memory_space<vmem>>, vector<1x1x128xf32>
    %160 = vector.shape_cast %159 : vector<1x1x128xf32> to vector<1x128xf32>
    %161 = vector.broadcast %160 : vector<1x128xf32> to vector<8x128xf32>
    %162 = arith.addf %158, %161 : vector<8x128xf32>
    %cst_83 = arith.constant 0.000000e+00 : f32
    %163 = vector.broadcast %cst_83 : f32 to vector<8x128xf32>
    %164 = arith.cmpf ogt, %162, %163 : vector<8x128xf32>
    %165 = math.exp %162 : vector<8x128xf32>
    %cst_84 = arith.constant 1.000000e+00 : f32
    %166 = vector.broadcast %cst_84 : f32 to vector<8x128xf32>
    %167 = arith.subf %165, %166 : vector<8x128xf32>
    %168 = arith.select %164, %162, %167 : vector<8x128xi1>, vector<8x128xf32>
    %169 = arith.truncf %168 : vector<8x128xf32> to vector<8x128xbf16>
    %c2_85 = arith.constant 2 : index
    %c0_86 = arith.constant 0 : index
    %c0_87 = arith.constant 0 : index
    %170 = vector.load %arg7[%c2_85, %c0_86, %c0_87] : memref<5x128x8xbf16, #tpu.memory_space<vmem>>, vector<1x128x8xbf16>
    %171 = vector.shape_cast %170 : vector<1x128x8xbf16> to vector<128x8xbf16>
    %cst_88 = arith.constant dense<0.000000e+00> : vector<8x8xf32>
    %172 = tpu.matmul %169, %171, %cst_88 {dimension_numbers = #tpu.dot_dimension_numbers<[1], [0], [0], [1], [0, 0, 1, 1], [], []>} : vector<8x128xbf16>, vector<128x8xbf16>, vector<8x8xf32> -> vector<8x8xf32>
    %173 = arith.addf %118, %172 : vector<8x8xf32>
    %c2_89 = arith.constant 2 : index
    %c0_90 = arith.constant 0 : index
    %c0_91 = arith.constant 0 : index
    %174 = vector.load %arg8[%c2_89, %c0_90, %c0_91] : memref<5x128x8xbf16, #tpu.memory_space<vmem>>, vector<1x128x8xbf16>
    %175 = vector.shape_cast %174 : vector<1x128x8xbf16> to vector<128x8xbf16>
    %cst_92 = arith.constant dense<0.000000e+00> : vector<8x8xf32>
    %176 = tpu.matmul %169, %175, %cst_92 {dimension_numbers = #tpu.dot_dimension_numbers<[1], [0], [0], [1], [0, 0, 1, 1], [], []>} : vector<8x128xbf16>, vector<128x8xbf16>, vector<8x8xf32> -> vector<8x8xf32>
    %177 = arith.addf %122, %176 : vector<8x8xf32>
    %c3 = arith.constant 3 : index
    %c0_93 = arith.constant 0 : index
    %c0_94 = arith.constant 0 : index
    %178 = vector.load %arg2[%c3, %c0_93, %c0_94] : memref<5x16x128xbf16, #tpu.memory_space<vmem>>, vector<1x16x128xbf16>
    %179 = vector.shape_cast %178 : vector<1x16x128xbf16> to vector<16x128xbf16>
    %cst_95 = arith.constant dense<0.000000e+00> : vector<8x128xf32>
    %180 = tpu.matmul %2, %179, %cst_95 {dimension_numbers = #tpu.dot_dimension_numbers<[1], [0], [0], [1], [0, 0, 1, 1], [], []>} : vector<8x16xbf16>, vector<16x128xbf16>, vector<8x128xf32> -> vector<8x128xf32>
    %c3_96 = arith.constant 3 : index
    %c0_97 = arith.constant 0 : index
    %c0_98 = arith.constant 0 : index
    %181 = vector.load %arg3[%c3_96, %c0_97, %c0_98] : memref<5x16x128xbf16, #tpu.memory_space<vmem>>, vector<1x16x128xbf16>
    %182 = vector.shape_cast %181 : vector<1x16x128xbf16> to vector<16x128xbf16>
    %cst_99 = arith.constant dense<0.000000e+00> : vector<8x128xf32>
    %183 = tpu.matmul %2, %182, %cst_99 {dimension_numbers = #tpu.dot_dimension_numbers<[1], [0], [0], [1], [0, 0, 1, 1], [], []>} : vector<8x16xbf16>, vector<16x128xbf16>, vector<8x128xf32> -> vector<8x128xf32>
    %184 = vector.extract_strided_slice %10 {offsets = [0, 3], sizes = [8, 1], strides = [1, 1]} : vector<8x8xf32> to vector<8x1xf32>
    %185 = vector.extract_strided_slice %8 {offsets = [0, 3], sizes = [8, 1], strides = [1, 1]} : vector<8x8xf32> to vector<8x1xf32>
    %186 = tpu.transpose %185, [1, 0] : vector<8x1xf32> -> vector<1x8xf32>
    %187 = vector.broadcast %184 : vector<8x1xf32> to vector<8x8xf32>
    %188 = vector.broadcast %186 : vector<1x8xf32> to vector<8x8xf32>
    %189 = arith.addf %187, %188 : vector<8x8xf32>
    %cst_100 = arith.constant 0.000000e+00 : f32
    %190 = vector.broadcast %cst_100 : f32 to vector<8x8xf32>
    %191 = arith.cmpf ogt, %189, %190 : vector<8x8xf32>
    %cst_101 = arith.constant 2.000000e-01 : f32
    %192 = vector.broadcast %cst_101 : f32 to vector<8x8xf32>
    %193 = arith.mulf %192, %189 : vector<8x8xf32>
    %194 = arith.select %191, %189, %193 : vector<8x8xi1>, vector<8x8xf32>
    %cst_102 = arith.constant -1.000000e+30 : f32
    %195 = vector.broadcast %cst_102 : f32 to vector<8x8xf32>
    %196 = arith.select %4, %194, %195 : vector<8x8xi1>, vector<8x8xf32>
    %cst_103 = arith.constant dense<0xFF800000> : vector<8xf32>
    %197 = vector.multi_reduction <maximumf>, %196, %cst_103 [1] : vector<8x8xf32> to vector<8xf32>
    %198 = vector.shape_cast %197 : vector<8xf32> to vector<8x1xf32>
    %199 = vector.broadcast %198 : vector<8x1xf32> to vector<8x8xf32>
    %200 = arith.subf %196, %199 : vector<8x8xf32>
    %201 = math.exp %200 : vector<8x8xf32>
    %202 = arith.mulf %201, %6 : vector<8x8xf32>
    %cst_104 = arith.constant dense<0.000000e+00> : vector<8xf32>
    %203 = vector.multi_reduction <add>, %202, %cst_104 [1] : vector<8x8xf32> to vector<8xf32>
    %204 = vector.shape_cast %203 : vector<8xf32> to vector<8x1xf32>
    %cst_105 = arith.constant 9.99999968E-21 : f32
    %205 = vector.broadcast %cst_105 : f32 to vector<8x1xf32>
    %206 = arith.maximumf %204, %205 : vector<8x1xf32>
    %207 = tpu.reciprocal %206 {approx = true} : vector<8x1xf32> -> vector<8x1xf32>
    %208 = vector.broadcast %207 : vector<8x1xf32> to vector<8x8xf32>
    %209 = arith.mulf %202, %208 : vector<8x8xf32>
    %210 = arith.truncf %209 : vector<8x8xf32> to vector<8x8xbf16>
    %211 = arith.truncf %180 : vector<8x128xf32> to vector<8x128xbf16>
    %cst_106 = arith.constant dense<0.000000e+00> : vector<8x128xf32>
    %212 = tpu.matmul %210, %211, %cst_106 {dimension_numbers = #tpu.dot_dimension_numbers<[1], [0], [0], [1], [0, 0, 1, 1], [], []>} : vector<8x8xbf16>, vector<8x128xbf16>, vector<8x128xf32> -> vector<8x128xf32>
    %213 = arith.addf %212, %183 : vector<8x128xf32>
    %c3_107 = arith.constant 3 : index
    %c0_108 = arith.constant 0 : index
    %c0_109 = arith.constant 0 : index
    %214 = vector.load %arg6[%c3_107, %c0_108, %c0_109] : memref<5x1x128xf32, #tpu.memory_space<vmem>>, vector<1x1x128xf32>
    %215 = vector.shape_cast %214 : vector<1x1x128xf32> to vector<1x128xf32>
    %216 = vector.broadcast %215 : vector<1x128xf32> to vector<8x128xf32>
    %217 = arith.addf %213, %216 : vector<8x128xf32>
    %cst_110 = arith.constant 0.000000e+00 : f32
    %218 = vector.broadcast %cst_110 : f32 to vector<8x128xf32>
    %219 = arith.cmpf ogt, %217, %218 : vector<8x128xf32>
    %220 = math.exp %217 : vector<8x128xf32>
    %cst_111 = arith.constant 1.000000e+00 : f32
    %221 = vector.broadcast %cst_111 : f32 to vector<8x128xf32>
    %222 = arith.subf %220, %221 : vector<8x128xf32>
    %223 = arith.select %219, %217, %222 : vector<8x128xi1>, vector<8x128xf32>
    %224 = arith.truncf %223 : vector<8x128xf32> to vector<8x128xbf16>
    %c3_112 = arith.constant 3 : index
    %c0_113 = arith.constant 0 : index
    %c0_114 = arith.constant 0 : index
    %225 = vector.load %arg7[%c3_112, %c0_113, %c0_114] : memref<5x128x8xbf16, #tpu.memory_space<vmem>>, vector<1x128x8xbf16>
    %226 = vector.shape_cast %225 : vector<1x128x8xbf16> to vector<128x8xbf16>
    %cst_115 = arith.constant dense<0.000000e+00> : vector<8x8xf32>
    %227 = tpu.matmul %224, %226, %cst_115 {dimension_numbers = #tpu.dot_dimension_numbers<[1], [0], [0], [1], [0, 0, 1, 1], [], []>} : vector<8x128xbf16>, vector<128x8xbf16>, vector<8x8xf32> -> vector<8x8xf32>
    %228 = arith.addf %173, %227 : vector<8x8xf32>
    %c3_116 = arith.constant 3 : index
    %c0_117 = arith.constant 0 : index
    %c0_118 = arith.constant 0 : index
    %229 = vector.load %arg8[%c3_116, %c0_117, %c0_118] : memref<5x128x8xbf16, #tpu.memory_space<vmem>>, vector<1x128x8xbf16>
    %230 = vector.shape_cast %229 : vector<1x128x8xbf16> to vector<128x8xbf16>
    %cst_119 = arith.constant dense<0.000000e+00> : vector<8x8xf32>
    %231 = tpu.matmul %224, %230, %cst_119 {dimension_numbers = #tpu.dot_dimension_numbers<[1], [0], [0], [1], [0, 0, 1, 1], [], []>} : vector<8x128xbf16>, vector<128x8xbf16>, vector<8x8xf32> -> vector<8x8xf32>
    %232 = arith.addf %177, %231 : vector<8x8xf32>
    %c4 = arith.constant 4 : index
    %c0_120 = arith.constant 0 : index
    %c0_121 = arith.constant 0 : index
    %233 = vector.load %arg2[%c4, %c0_120, %c0_121] : memref<5x16x128xbf16, #tpu.memory_space<vmem>>, vector<1x16x128xbf16>
    %234 = vector.shape_cast %233 : vector<1x16x128xbf16> to vector<16x128xbf16>
    %cst_122 = arith.constant dense<0.000000e+00> : vector<8x128xf32>
    %235 = tpu.matmul %2, %234, %cst_122 {dimension_numbers = #tpu.dot_dimension_numbers<[1], [0], [0], [1], [0, 0, 1, 1], [], []>} : vector<8x16xbf16>, vector<16x128xbf16>, vector<8x128xf32> -> vector<8x128xf32>
    %c4_123 = arith.constant 4 : index
    %c0_124 = arith.constant 0 : index
    %c0_125 = arith.constant 0 : index
    %236 = vector.load %arg3[%c4_123, %c0_124, %c0_125] : memref<5x16x128xbf16, #tpu.memory_space<vmem>>, vector<1x16x128xbf16>
    %237 = vector.shape_cast %236 : vector<1x16x128xbf16> to vector<16x128xbf16>
    %cst_126 = arith.constant dense<0.000000e+00> : vector<8x128xf32>
    %238 = tpu.matmul %2, %237, %cst_126 {dimension_numbers = #tpu.dot_dimension_numbers<[1], [0], [0], [1], [0, 0, 1, 1], [], []>} : vector<8x16xbf16>, vector<16x128xbf16>, vector<8x128xf32> -> vector<8x128xf32>
    %239 = vector.extract_strided_slice %10 {offsets = [0, 4], sizes = [8, 1], strides = [1, 1]} : vector<8x8xf32> to vector<8x1xf32>
    %240 = vector.extract_strided_slice %8 {offsets = [0, 4], sizes = [8, 1], strides = [1, 1]} : vector<8x8xf32> to vector<8x1xf32>
    %241 = tpu.transpose %240, [1, 0] : vector<8x1xf32> -> vector<1x8xf32>
    %242 = vector.broadcast %239 : vector<8x1xf32> to vector<8x8xf32>
    %243 = vector.broadcast %241 : vector<1x8xf32> to vector<8x8xf32>
    %244 = arith.addf %242, %243 : vector<8x8xf32>
    %cst_127 = arith.constant 0.000000e+00 : f32
    %245 = vector.broadcast %cst_127 : f32 to vector<8x8xf32>
    %246 = arith.cmpf ogt, %244, %245 : vector<8x8xf32>
    %cst_128 = arith.constant 2.000000e-01 : f32
    %247 = vector.broadcast %cst_128 : f32 to vector<8x8xf32>
    %248 = arith.mulf %247, %244 : vector<8x8xf32>
    %249 = arith.select %246, %244, %248 : vector<8x8xi1>, vector<8x8xf32>
    %cst_129 = arith.constant -1.000000e+30 : f32
    %250 = vector.broadcast %cst_129 : f32 to vector<8x8xf32>
    %251 = arith.select %4, %249, %250 : vector<8x8xi1>, vector<8x8xf32>
    %cst_130 = arith.constant dense<0xFF800000> : vector<8xf32>
    %252 = vector.multi_reduction <maximumf>, %251, %cst_130 [1] : vector<8x8xf32> to vector<8xf32>
    %253 = vector.shape_cast %252 : vector<8xf32> to vector<8x1xf32>
    %254 = vector.broadcast %253 : vector<8x1xf32> to vector<8x8xf32>
    %255 = arith.subf %251, %254 : vector<8x8xf32>
    %256 = math.exp %255 : vector<8x8xf32>
    %257 = arith.mulf %256, %6 : vector<8x8xf32>
    %cst_131 = arith.constant dense<0.000000e+00> : vector<8xf32>
    %258 = vector.multi_reduction <add>, %257, %cst_131 [1] : vector<8x8xf32> to vector<8xf32>
    %259 = vector.shape_cast %258 : vector<8xf32> to vector<8x1xf32>
    %cst_132 = arith.constant 9.99999968E-21 : f32
    %260 = vector.broadcast %cst_132 : f32 to vector<8x1xf32>
    %261 = arith.maximumf %259, %260 : vector<8x1xf32>
    %262 = tpu.reciprocal %261 {approx = true} : vector<8x1xf32> -> vector<8x1xf32>
    %263 = vector.broadcast %262 : vector<8x1xf32> to vector<8x8xf32>
    %264 = arith.mulf %257, %263 : vector<8x8xf32>
    %265 = arith.truncf %264 : vector<8x8xf32> to vector<8x8xbf16>
    %266 = arith.truncf %235 : vector<8x128xf32> to vector<8x128xbf16>
    %cst_133 = arith.constant dense<0.000000e+00> : vector<8x128xf32>
    %267 = tpu.matmul %265, %266, %cst_133 {dimension_numbers = #tpu.dot_dimension_numbers<[1], [0], [0], [1], [0, 0, 1, 1], [], []>} : vector<8x8xbf16>, vector<8x128xbf16>, vector<8x128xf32> -> vector<8x128xf32>
    %268 = arith.addf %267, %238 : vector<8x128xf32>
    %c4_134 = arith.constant 4 : index
    %c0_135 = arith.constant 0 : index
    %c0_136 = arith.constant 0 : index
    %269 = vector.load %arg6[%c4_134, %c0_135, %c0_136] : memref<5x1x128xf32, #tpu.memory_space<vmem>>, vector<1x1x128xf32>
    %270 = vector.shape_cast %269 : vector<1x1x128xf32> to vector<1x128xf32>
    %271 = vector.broadcast %270 : vector<1x128xf32> to vector<8x128xf32>
    %272 = arith.addf %268, %271 : vector<8x128xf32>
    %cst_137 = arith.constant 0.000000e+00 : f32
    %273 = vector.broadcast %cst_137 : f32 to vector<8x128xf32>
    %274 = arith.cmpf ogt, %272, %273 : vector<8x128xf32>
    %275 = math.exp %272 : vector<8x128xf32>
    %cst_138 = arith.constant 1.000000e+00 : f32
    %276 = vector.broadcast %cst_138 : f32 to vector<8x128xf32>
    %277 = arith.subf %275, %276 : vector<8x128xf32>
    %278 = arith.select %274, %272, %277 : vector<8x128xi1>, vector<8x128xf32>
    %279 = arith.truncf %278 : vector<8x128xf32> to vector<8x128xbf16>
    %c4_139 = arith.constant 4 : index
    %c0_140 = arith.constant 0 : index
    %c0_141 = arith.constant 0 : index
    %280 = vector.load %arg7[%c4_139, %c0_140, %c0_141] : memref<5x128x8xbf16, #tpu.memory_space<vmem>>, vector<1x128x8xbf16>
    %281 = vector.shape_cast %280 : vector<1x128x8xbf16> to vector<128x8xbf16>
    %cst_142 = arith.constant dense<0.000000e+00> : vector<8x8xf32>
    %282 = tpu.matmul %279, %281, %cst_142 {dimension_numbers = #tpu.dot_dimension_numbers<[1], [0], [0], [1], [0, 0, 1, 1], [], []>} : vector<8x128xbf16>, vector<128x8xbf16>, vector<8x8xf32> -> vector<8x8xf32>
    %283 = arith.addf %228, %282 : vector<8x8xf32>
    %c4_143 = arith.constant 4 : index
    %c0_144 = arith.constant 0 : index
    %c0_145 = arith.constant 0 : index
    %284 = vector.load %arg8[%c4_143, %c0_144, %c0_145] : memref<5x128x8xbf16, #tpu.memory_space<vmem>>, vector<1x128x8xbf16>
    %285 = vector.shape_cast %284 : vector<1x128x8xbf16> to vector<128x8xbf16>
    %cst_146 = arith.constant dense<0.000000e+00> : vector<8x8xf32>
    %286 = tpu.matmul %279, %285, %cst_146 {dimension_numbers = #tpu.dot_dimension_numbers<[1], [0], [0], [1], [0, 0, 1, 1], [], []>} : vector<8x128xbf16>, vector<128x8xbf16>, vector<8x8xf32> -> vector<8x8xf32>
    %287 = arith.addf %232, %286 : vector<8x8xf32>
    %288 = arith.truncf %283 : vector<8x8xf32> to vector<8x8xbf16>
    %c0_147 = arith.constant 0 : index
    %c0_148 = arith.constant 0 : index
    %289 = vector.load %arg9[%c0_147, %c0_148] : memref<8x2xbf16, #tpu.memory_space<vmem>>, vector<8x2xbf16>
    %cst_149 = arith.constant dense<0.000000e+00> : vector<8x2xf32>
    %290 = tpu.matmul %288, %289, %cst_149 {dimension_numbers = #tpu.dot_dimension_numbers<[1], [0], [0], [1], [0, 0, 1, 1], [], []>} : vector<8x8xbf16>, vector<8x2xbf16>, vector<8x2xf32> -> vector<8x2xf32>
    %291 = vector.extract_strided_slice %290 {offsets = [0, 1], sizes = [8, 1], strides = [1, 1]} : vector<8x2xf32> to vector<8x1xf32>
    %292 = vector.extract_strided_slice %290 {offsets = [0, 0], sizes = [8, 1], strides = [1, 1]} : vector<8x2xf32> to vector<8x1xf32>
    %293 = tpu.transpose %292, [1, 0] : vector<8x1xf32> -> vector<1x8xf32>
    %294 = vector.broadcast %291 : vector<8x1xf32> to vector<8x8xf32>
    %295 = vector.broadcast %293 : vector<1x8xf32> to vector<8x8xf32>
    %296 = arith.addf %294, %295 : vector<8x8xf32>
    %cst_150 = arith.constant 0.000000e+00 : f32
    %297 = vector.broadcast %cst_150 : f32 to vector<8x8xf32>
    %298 = arith.cmpf ogt, %296, %297 : vector<8x8xf32>
    %cst_151 = arith.constant 2.000000e-01 : f32
    %299 = vector.broadcast %cst_151 : f32 to vector<8x8xf32>
    %300 = arith.mulf %299, %296 : vector<8x8xf32>
    %301 = arith.select %298, %296, %300 : vector<8x8xi1>, vector<8x8xf32>
    %cst_152 = arith.constant -1.000000e+30 : f32
    %302 = vector.broadcast %cst_152 : f32 to vector<8x8xf32>
    %303 = arith.select %4, %301, %302 : vector<8x8xi1>, vector<8x8xf32>
    %cst_153 = arith.constant dense<0xFF800000> : vector<8xf32>
    %304 = vector.multi_reduction <maximumf>, %303, %cst_153 [1] : vector<8x8xf32> to vector<8xf32>
    %305 = vector.shape_cast %304 : vector<8xf32> to vector<8x1xf32>
    %306 = vector.broadcast %305 : vector<8x1xf32> to vector<8x8xf32>
    %307 = arith.subf %303, %306 : vector<8x8xf32>
    %308 = math.exp %307 : vector<8x8xf32>
    %309 = arith.mulf %308, %6 : vector<8x8xf32>
    %cst_154 = arith.constant dense<0.000000e+00> : vector<8xf32>
    %310 = vector.multi_reduction <add>, %309, %cst_154 [1] : vector<8x8xf32> to vector<8xf32>
    %311 = vector.shape_cast %310 : vector<8xf32> to vector<8x1xf32>
    %cst_155 = arith.constant 9.99999968E-21 : f32
    %312 = vector.broadcast %cst_155 : f32 to vector<8x1xf32>
    %313 = arith.maximumf %311, %312 : vector<8x1xf32>
    %314 = tpu.reciprocal %313 {approx = true} : vector<8x1xf32> -> vector<8x1xf32>
    %315 = vector.broadcast %314 : vector<8x1xf32> to vector<8x8xf32>
    %316 = arith.mulf %309, %315 : vector<8x8xf32>
    %317 = arith.truncf %316 : vector<8x8xf32> to vector<8x8xbf16>
    %cst_156 = arith.constant dense<0.000000e+00> : vector<8x8xf32>
    %318 = tpu.matmul %317, %288, %cst_156 {dimension_numbers = #tpu.dot_dimension_numbers<[1], [0], [0], [1], [0, 0, 1, 1], [], []>} : vector<8x8xbf16>, vector<8x8xbf16>, vector<8x8xf32> -> vector<8x8xf32>
    %319 = arith.addf %318, %287 : vector<8x8xf32>
    %c0_157 = arith.constant 0 : index
    %c0_158 = arith.constant 0 : index
    %320 = vector.load %arg10[%c0_157, %c0_158] : memref<1x8xf32, #tpu.memory_space<vmem>>, vector<1x8xf32>
    %321 = vector.broadcast %320 : vector<1x8xf32> to vector<8x8xf32>
    %322 = arith.addf %319, %321 : vector<8x8xf32>
    %cst_159 = arith.constant dense<0.000000e+00> : vector<8xf32>
    %323 = vector.multi_reduction <add>, %0, %cst_159 [1] : vector<8x8xf32> to vector<8xf32>
    %324 = vector.shape_cast %323 : vector<8xf32> to vector<8x1xf32>
    %cst_160 = arith.constant dense<0.000000e+00> : vector<8xf32>
    %325 = vector.multi_reduction <add>, %0, %cst_160 [0] : vector<8x8xf32> to vector<8xf32>
    %326 = vector.shape_cast %325 : vector<8xf32> to vector<1x8xf32>
    %cst_161 = arith.constant 1.000000e+00 : f32
    %327 = vector.broadcast %cst_161 : f32 to vector<8x1xf32>
    %328 = arith.maximumf %324, %327 : vector<8x1xf32>
    %329 = math.rsqrt %328 : vector<8x1xf32>
    %cst_162 = arith.constant 1.000000e+00 : f32
    %330 = vector.broadcast %cst_162 : f32 to vector<1x8xf32>
    %331 = arith.maximumf %326, %330 : vector<1x8xf32>
    %332 = math.rsqrt %331 : vector<1x8xf32>
    %333 = vector.broadcast %332 : vector<1x8xf32> to vector<8x8xf32>
    %334 = arith.mulf %0, %333 : vector<8x8xf32>
    %335 = arith.truncf %334 : vector<8x8xf32> to vector<8x8xbf16>
    %336 = arith.truncf %1 : vector<8x16xf32> to vector<8x16xbf16>
    %c0_163 = arith.constant 0 : index
    %c0_164 = arith.constant 0 : index
    %337 = vector.load %arg11[%c0_163, %c0_164] : memref<16x384xbf16, #tpu.memory_space<vmem>>, vector<16x384xbf16>
    %cst_165 = arith.constant dense<0.000000e+00> : vector<8x384xf32>
    %338 = tpu.matmul %336, %337, %cst_165 {dimension_numbers = #tpu.dot_dimension_numbers<[1], [0], [0], [1], [0, 0, 1, 1], [], []>} : vector<8x16xbf16>, vector<16x384xbf16>, vector<8x384xf32> -> vector<8x384xf32>
    %339 = arith.truncf %338 : vector<8x384xf32> to vector<8x384xbf16>
    %cst_166 = arith.constant dense<0.000000e+00> : vector<8x384xf32>
    %340 = tpu.matmul %335, %339, %cst_166 {dimension_numbers = #tpu.dot_dimension_numbers<[1], [0], [0], [1], [0, 0, 1, 1], [], []>} : vector<8x8xbf16>, vector<8x384xbf16>, vector<8x384xf32> -> vector<8x384xf32>
    %341 = vector.broadcast %329 : vector<8x1xf32> to vector<8x384xf32>
    %342 = arith.mulf %340, %341 : vector<8x384xf32>
    %c0_167 = arith.constant 0 : index
    %c0_168 = arith.constant 0 : index
    %343 = vector.load %arg12[%c0_167, %c0_168] : memref<1x384xf32, #tpu.memory_space<vmem>>, vector<1x384xf32>
    %344 = vector.broadcast %343 : vector<1x384xf32> to vector<8x384xf32>
    %345 = arith.addf %342, %344 : vector<8x384xf32>
    %cst_169 = arith.constant 0.000000e+00 : f32
    %346 = vector.broadcast %cst_169 : f32 to vector<8x384xf32>
    %347 = arith.maximumf %345, %346 : vector<8x384xf32>
    %348 = arith.truncf %347 : vector<8x384xf32> to vector<8x384xbf16>
    %c0_170 = arith.constant 0 : index
    %c0_171 = arith.constant 0 : index
    %349 = vector.load %arg13[%c0_170, %c0_171] : memref<384x128xbf16, #tpu.memory_space<vmem>>, vector<384x128xbf16>
    %cst_172 = arith.constant dense<0.000000e+00> : vector<8x128xf32>
    %350 = tpu.matmul %348, %349, %cst_172 {dimension_numbers = #tpu.dot_dimension_numbers<[1], [0], [0], [1], [0, 0, 1, 1], [], []>} : vector<8x384xbf16>, vector<384x128xbf16>, vector<8x128xf32> -> vector<8x128xf32>
    %351 = arith.truncf %350 : vector<8x128xf32> to vector<8x128xbf16>
    %cst_173 = arith.constant dense<0.000000e+00> : vector<8x128xf32>
    %352 = tpu.matmul %335, %351, %cst_173 {dimension_numbers = #tpu.dot_dimension_numbers<[1], [0], [0], [1], [0, 0, 1, 1], [], []>} : vector<8x8xbf16>, vector<8x128xbf16>, vector<8x128xf32> -> vector<8x128xf32>
    %353 = vector.broadcast %329 : vector<8x1xf32> to vector<8x128xf32>
    %354 = arith.mulf %352, %353 : vector<8x128xf32>
    %c0_174 = arith.constant 0 : index
    %c0_175 = arith.constant 0 : index
    %355 = vector.load %arg14[%c0_174, %c0_175] : memref<1x128xf32, #tpu.memory_space<vmem>>, vector<1x128xf32>
    %356 = vector.broadcast %355 : vector<1x128xf32> to vector<8x128xf32>
    %357 = arith.addf %354, %356 : vector<8x128xf32>
    %cst_176 = arith.constant 0.000000e+00 : f32
    %358 = vector.broadcast %cst_176 : f32 to vector<8x128xf32>
    %359 = arith.maximumf %357, %358 : vector<8x128xf32>
    %360 = arith.truncf %359 : vector<8x128xf32> to vector<8x128xbf16>
    %c0_177 = arith.constant 0 : index
    %c0_178 = arith.constant 0 : index
    %361 = vector.load %arg15[%c0_177, %c0_178] : memref<128x8xbf16, #tpu.memory_space<vmem>>, vector<128x8xbf16>
    %cst_179 = arith.constant dense<0.000000e+00> : vector<8x8xf32>
    %362 = tpu.matmul %360, %361, %cst_179 {dimension_numbers = #tpu.dot_dimension_numbers<[1], [0], [0], [1], [0, 0, 1, 1], [], []>} : vector<8x128xbf16>, vector<128x8xbf16>, vector<8x8xf32> -> vector<8x8xf32>
    %363 = arith.truncf %362 : vector<8x8xf32> to vector<8x8xbf16>
    %cst_180 = arith.constant dense<0.000000e+00> : vector<8x8xf32>
    %364 = tpu.matmul %335, %363, %cst_180 {dimension_numbers = #tpu.dot_dimension_numbers<[1], [0], [0], [1], [0, 0, 1, 1], [], []>} : vector<8x8xbf16>, vector<8x8xbf16>, vector<8x8xf32> -> vector<8x8xf32>
    %365 = vector.broadcast %329 : vector<8x1xf32> to vector<8x8xf32>
    %366 = arith.mulf %364, %365 : vector<8x8xf32>
    %c0_181 = arith.constant 0 : index
    %c0_182 = arith.constant 0 : index
    %367 = vector.load %arg16[%c0_181, %c0_182] : memref<1x8xf32, #tpu.memory_space<vmem>>, vector<1x8xf32>
    %368 = vector.broadcast %367 : vector<1x8xf32> to vector<8x8xf32>
    %369 = arith.addf %366, %368 : vector<8x8xf32>
    %370 = arith.truncf %322 : vector<8x8xf32> to vector<8x8xbf16>
    %c0_183 = arith.constant 0 : index
    %c0_184 = arith.constant 0 : index
    %371 = vector.load %arg17[%c0_183, %c0_184] : memref<8x128xbf16, #tpu.memory_space<vmem>>, vector<8x128xbf16>
    %cst_185 = arith.constant dense<0.000000e+00> : vector<8x128xf32>
    %372 = tpu.matmul %370, %371, %cst_185 {dimension_numbers = #tpu.dot_dimension_numbers<[1], [0], [0], [1], [0, 0, 1, 1], [], []>} : vector<8x8xbf16>, vector<8x128xbf16>, vector<8x128xf32> -> vector<8x128xf32>
    %373 = arith.truncf %369 : vector<8x8xf32> to vector<8x8xbf16>
    %c0_186 = arith.constant 0 : index
    %c0_187 = arith.constant 0 : index
    %374 = vector.load %arg18[%c0_186, %c0_187] : memref<8x128xbf16, #tpu.memory_space<vmem>>, vector<8x128xbf16>
    %cst_188 = arith.constant dense<0.000000e+00> : vector<8x128xf32>
    %375 = tpu.matmul %373, %374, %cst_188 {dimension_numbers = #tpu.dot_dimension_numbers<[1], [0], [0], [1], [0, 0, 1, 1], [], []>} : vector<8x8xbf16>, vector<8x128xbf16>, vector<8x128xf32> -> vector<8x128xf32>
    %376 = arith.addf %372, %375 : vector<8x128xf32>
    %c0_189 = arith.constant 0 : index
    %c0_190 = arith.constant 0 : index
    %377 = vector.load %arg19[%c0_189, %c0_190] : memref<1x128xf32, #tpu.memory_space<vmem>>, vector<1x128xf32>
    %378 = vector.broadcast %377 : vector<1x128xf32> to vector<8x128xf32>
    %379 = arith.addf %376, %378 : vector<8x128xf32>
    %cst_191 = arith.constant 0.000000e+00 : f32
    %380 = vector.broadcast %cst_191 : f32 to vector<8x128xf32>
    %381 = arith.cmpf ogt, %379, %380 : vector<8x128xf32>
    %cst_192 = arith.constant 2.500000e-01 : f32
    %382 = vector.broadcast %cst_192 : f32 to vector<8x128xf32>
    %383 = arith.mulf %382, %379 : vector<8x128xf32>
    %384 = arith.select %381, %379, %383 : vector<8x128xi1>, vector<8x128xf32>
    %385 = arith.truncf %384 : vector<8x128xf32> to vector<8x128xbf16>
    %c0_193 = arith.constant 0 : index
    %c0_194 = arith.constant 0 : index
    %386 = vector.load %arg20[%c0_193, %c0_194] : memref<128x128xbf16, #tpu.memory_space<vmem>>, vector<128x128xbf16>
    %cst_195 = arith.constant dense<0.000000e+00> : vector<8x128xf32>
    %387 = tpu.matmul %385, %386, %cst_195 {dimension_numbers = #tpu.dot_dimension_numbers<[1], [0], [0], [1], [0, 0, 1, 1], [], []>} : vector<8x128xbf16>, vector<128x128xbf16>, vector<8x128xf32> -> vector<8x128xf32>
    %c0_196 = arith.constant 0 : index
    %c0_197 = arith.constant 0 : index
    %388 = vector.load %arg21[%c0_196, %c0_197] : memref<1x128xf32, #tpu.memory_space<vmem>>, vector<1x128xf32>
    %389 = vector.broadcast %388 : vector<1x128xf32> to vector<8x128xf32>
    %390 = arith.addf %387, %389 : vector<8x128xf32>
    %c0_198 = arith.constant 0 : index
    %c0_199 = arith.constant 0 : index
    %391 = vector.load %arg22[%c0_198, %c0_199] : memref<8x128xf32, #tpu.memory_space<vmem>>, vector<8x128xf32>
    tpu.vector_store %arg22[%c0_198, %c0_199], %390 {strides = array<i32>} : memref<8x128xf32, #tpu.memory_space<vmem>>, vector<8x128xf32>,
    return
  }
}

</mosaic_0001>

<bundles_post_ra>
// kernel: tpu_custom_call.1
= control target key start
LH: loop header
LB: loop body
LE: loop exit
PB: predicated region body
PF: predicated region fallthrough
CT: control target
= control target key end

     0   :  { %s5596_s0 = inlined_call_operand.vmem [shape: f32[8,8], index: 0, kind: input, shape index: {}]   ;;  %s5597_s1 = inlined_call_operand.vmem [shape: f32[8,16], index: 1, kind: input, shape index: {}]   ;;  %s5598_s2 = inlined_call_operand.vmem [shape: bf16[5,16,128], index: 2, kind: input, shape index: {}]   ;;  %s5599_s3 = inlined_call_operand.vmem [shape: bf16[5,16,128], index: 3, kind: input, shape index: {}]   ;;  %s5600_s4 = inlined_call_operand.vmem [shape: bf16[16,8], index: 4, kind: input, shape index: {}]   ;;  %s5601_s5 = inlined_call_operand.vmem [shape: bf16[16,8], index: 5, kind: input, shape index: {}]   ;;  %s5602_s6 = inlined_call_operand.vmem [shape: f32[5,1,128], index: 6, kind: input, shape index: {}]   ;;  %s5603_s7 = inlined_call_operand.vmem [shape: bf16[5,128,8], index: 7, kind: input, shape index: {}]   ;;  %s5604_s8 = inlined_call_operand.vmem [shape: bf16[5,128,8], index: 8, kind: input, shape index: {}]   ;;  %s5605_s9 = inlined_call_operand.vmem [shape: bf16[8,2], index: 9, kind: input, shape index: {}]   ;;  %s5606_s10 = inlined_call_operand.vmem [shape: f32[1,8], index: 10, kind: input, shape index: {}]   ;;  %s5607_s11 = inlined_call_operand.vmem [shape: bf16[16,384], index: 11, kind: input, shape index: {}]   ;;  %s5608_s12 = inlined_call_operand.vmem [shape: f32[1,384], index: 12, kind: input, shape index: {}]   ;;  %s5609_s13 = inlined_call_operand.vmem [shape: bf16[384,128], index: 13, kind: input, shape index: {}]   ;;  %s5610_s14 = inlined_call_operand.vmem [shape: f32[1,128], index: 14, kind: input, shape index: {}]   ;;  %s5611_s15 = inlined_call_operand.vmem [shape: bf16[128,8], index: 15, kind: input, shape index: {}]   ;;  %s5612_s16 = inlined_call_operand.vmem [shape: f32[1,8], index: 16, kind: input, shape index: {}]   ;;  %s5613_s17 = inlined_call_operand.vmem [shape: bf16[8,128], index: 17, kind: input, shape index: {}]   ;;  %s5614_s18 = inlined_call_operand.vmem [shape: bf16[8,128], index: 18, kind: input, shape index: {}]   ;;  %s5615_s19 = inlined_call_operand.vmem [shape: f32[1,128], index: 19, kind: input, shape index: {}]   ;;  %s5616_s20 = inlined_call_operand.vmem [shape: bf16[128,128], index: 20, kind: input, shape index: {}]   ;;  %s5617_s21 = inlined_call_operand.vmem [shape: f32[1,128], index: 21, kind: input, shape index: {}]   ;;  %s5618_s22 = inlined_call_operand.hbm [shape: f32[8,128], index: 22, kind: output, shape index: {}]  }
   0x1   :  { %5623 = sst [smem:[#allocation5_spill]] %s5596_s0 }
   0x2   :  { %5624 = sst [smem:[#allocation6_spill]] %s5597_s1 }
   0x3   :  { %5625 = sst [smem:[#allocation7_spill]] %s5598_s2 }
   0x4   :  { %5626 = sst [smem:[#allocation8_spill]] %s5599_s3 }
   0x5   :  { %5627 = sst [smem:[#allocation9_spill]] %s5600_s4 }
   0x6   :  { %5628 = sst [smem:[#allocation10_spill]] %s5601_s5 }
   0x7   :  { %5629 = sst [smem:[#allocation11_spill]] %s5602_s6 }
   0x8   :  { %s5630_s29 = sld [smem:[#allocation9_spill]]  ;;  %v4620_v1 = vmov 0.0   ;;  %s5631_s0 = sld [smem:[#allocation6_spill]]  ;;  %vm87_vm0 = vcmask 130048   ;;  %vm4621_vm1 = vmmov 0  }
   0x9   :  { %3977 = vmatprep.subr.bf16.mxu0 %v4620_v1  ;;  %s5632_s5 = sld [smem:[#allocation10_spill]]  ;;  %3995 = vmatprep.subr.bf16.mxu1 %v4620_v1 }
   0xa   :  { %3979 = vmatprep.mubr.msk.bf16.mxu0 %vm4621_vm1, %v4620_v1  ;;  %3997 = vmatprep.mubr.msk.bf16.mxu1 %vm4621_vm1, %v4620_v1 }
   0xe   :  { %v4421_v0 = vld [vmem:[%s5630_s29] sm:$0xff]  }
   0xf   :  { %v74_v2 = vld [vmem:[%s5631_s0] sm:$0xff]  ;;  %3978 = vmatpush3.bf16.msra.mxu0 %v4421_v0 }
  0x10   :  { %v4422_v3 = vld [vmem:[%s5632_s5] sm:$0xff]   ;;  %v4760_v4 = vpack.c.bf16 %v74_v2, %v74_v2  ;;  %3983 = vmatprep.subr.bf16.mxu0 %v4620_v1 }
  0x12   :  { %3980 = vmatmul.mubr.msk.bf16.vlgmr.msra.gmra.mrb[0].mxu0 %vm87_vm0, %v4760_v4 }
  0x13   :  { %3984 = vmatpush3.bf16.msra.mxu0 %v4422_v3  ;;  %3985 = vmatprep.mubr.msk.bf16.mxu0 %vm4621_vm1, %v4620_v1 }
  0x14   :  { %3989 = vmatprep.subr.bf16.mxu0 %v4620_v1 }
  0x1a   :  { %3986 = vmatmul.mubr.msk.bf16.vlgmr.msra.gmra.mrb[4].mxu0 %vm87_vm0, %v4760_v4 }
  0x1b   :  { %3991 = vmatprep.mubr.msk.bf16.mxu0 %vm4621_vm1, %v4620_v1 }
  0x1c   :  { %27 = vsyncpa [#allocation3], 0  ;;  %v4622_v5 = vmov 1   ;;  %v4623_v6 = vmov 0   ;;  %s4624_s24 = smov 127   ;;  %s5633_s26 = sld [smem:[#allocation7_spill]]  ;;  %v312_v17 = vlaneseq }
  0x1d   :  { %4416 = vset.pattern.permute.xlu1 %v4622_v5  ;;  %4415 = vset.pattern.permute.xlu0 %v4623_v6  ;;  %s5634_s3 = sld [smem:[#allocation5_spill]]  ;;  %vm321_vm4 = vcmask 64512   ;;  %s5635_s30 = sld [smem:[#allocation8_spill]]  ;;  %v4625_v39 = vmov 2   ;;  %vm340_vm6 = vcmask 1043456  }
  0x1e   :  { %v4792_v18 = vshrl.u32 %v312_v17, 7  ;;  %s4626_s23 = smov 126   ;;  %s5636_s5 = sld [smem:[#allocation11_spill]] }
  0x1f   :  { %s4630_s28 = smov 124  }
  0x20   :  { %v4795_v20 = vsub.s32 0, %v4792_v18 }
  0x22   :  { %v4423_v16 = vld [vmem:[%s5633_s26] sm:$0xff]   ;;  %v4425_v31 = vld [vmem:[%s5633_s26 + $0x8] sm:$0xff]  }
  0x23   :  { %3990 = vmatpush3.bf16.msra.mxu0 %v4423_v16  ;;  %v4801_v24 = vld [vmem:[%s5634_s3] sm:$0xff]  ;;  %v4426_v16 = vld [vmem:[%s5635_s30 + $0x8] sm:$0xff]  }
  0x24   :  { %4001 = vmatprep.subr.bf16.mxu0 %v4620_v1  ;;  %vm76_vm2 = vcmp.gt.f32.partialorder %v4801_v24, 0.0  ;;  %v4424_v30 = vld [vmem:[%s5635_s30] sm:$0xff]  }
  0x25   :  { %3996 = vmatpush3.bf16.msra.mxu1 %v4424_v30  ;;  %v4830_v43 = vsel %vm76_vm2, 1.0, %v4620_v1 }
  0x26   :  { %3992 = vmatmul.mubr.msk.bf16.vlgmr.msra.gmra.mrb[8].mxu0 %vm87_vm0, %v4760_v4  ;;  %4007 = vmatprep.subr.bf16.mxu1 %v4620_v1 }
  0x27   :  { %4003 = vmatprep.mubr.msk.bf16.mxu0 %vm4621_vm1, %v4620_v1 }
  0x28   :  { %3998 = vmatmul.mubr.msk.bf16.vlgmr.msra.gmra.mrb[0].mxu1 %vm87_vm0, %v4760_v4 }
  0x29   :  { %4009 = vmatprep.mubr.msk.bf16.mxu1 %vm4621_vm1, %v4620_v1  ;;  %4008 = vmatpush3.bf16.msra.mxu1 %v4425_v31 }
  0x2a   :  { %4019 = vmatprep.subr.bf16.mxu1 %v4620_v1 }
  0x30   :  { %4010 = vmatmul.mubr.msk.bf16.vlgmr.msra.gmra.mrb[4].mxu1 %vm87_vm0, %v4760_v4 }
  0x31   :  { %4021 = vmatprep.mubr.msk.bf16.mxu1 %vm4621_vm1, %v4620_v1 }
  0xe5   :  { %v4776_v7 = vpop.f32.mrb[0].mxu0 }
  0xe6   :  { %529 = vrot.lane.b32.xlu0 %v4776_v7, %s4624_s24  ;;  %v3981_v8 = vpop.f32.mrb[1].mxu0  ;;  %s4627_s24 = smov 125  }
  0xe7   :  { %v128_v9 = vpop.f32.mrb[2].mxu0 }
  0xe8   :  { %v3982_v10 = vpop.f32.mrb[3].mxu0 }
  0xed   :  { %v4779_v11 = vpop.f32.mrb[4].mxu0 }
  0xee   :  { %565 = vperm.xlu1 %4416, %v4779_v11   ;;  %309 = vperm.xlu0 %4415, %v4779_v11   ;;  %v3987_v12 = vpop.f32.mrb[5].mxu0 }
  0xef   :  { %v176_v13 = vpop.f32.mrb[6].mxu0 }
  0xf0   :  { %v3988_v14 = vpop.f32.mrb[7].mxu0 }
  0xf9   :  { %v221_v47 = vpop.f32.mrb[8].mxu0 }
  0xfa   :  { %v336_v48 = vpack.c.bf16 %v221_v47, %v221_v47  ;;  %v3993_v49 = vpop.f32.mrb[9].mxu0  ;;  %v4439_v47 = vld [vmem:[%s5603_s7 + $0x70] sm:$0xff]  }
  0xfb   :  { %v224_v50 = vpop.f32.mrb[10].mxu0  ;;  %v4839_v59 = vpop.f32.mrb[0].mxu1  ;;  %v4441_v49 = vld [vmem:[%s5603_s7 + $0x78] sm:$0xff]  }
  0xfc   :  { %v342_v51 = vsel %vm340_vm6, %v336_v48, 0  ;;  %v3994_v52 = vpop.f32.mrb[11].mxu0  ;;  %v3999_v60 = vpop.f32.mrb[1].mxu1  ;;  %v4440_v48 = vld [vmem:[%s5604_s8 + $0x70] sm:$0xff]   ;;  %v4442_v50 = vld [vmem:[%s5604_s8 + $0x78] sm:$0xff]  }
  0xfd   :  { %4002 = vmatpush3.bf16.msra.mxu0 %v342_v51  ;;  %v272_v61 = vpop.f32.mrb[2].mxu1  ;;  %v4628_v51 = vmov 3  }
  0xfe   :  { %4013 = vmatprep.subr.bf16.mxu0 %v4620_v1  ;;  %v4000_v62 = vpop.f32.mrb[3].mxu1 }
 0x103   :  { %v473_v63 = vpop.f32.mrb[4].mxu1 }
 0x104   :  { %v4011_v0 = vpop.f32.mrb[5].mxu1  ;;  %v591_v8 = vpack.c.bf16 %v473_v63, %v473_v63 }
 0x105   :  { %v476_v2 = vpop.f32.mrb[6].mxu1 }
 0x106   :  { %v4012_v3 = vpop.f32.mrb[7].mxu1  ;;  %v596_v9 = vsel %vm340_vm6, %v591_v8, 0  ;;  %v3483_v8 = vld [vmem:[%s5636_s5 + $0x1] ss:$0 sm:$0xff] }
 0x107   :  { %4020 = vmatpush3.bf16.msra.mxu1 %v596_v9 }
 0x108   :  { %4065 = vmatprep.subr.bf16.mxu1 %v4620_v1 }
 0x117   :  { %275 = vxpose.xlu1.b32.start.end [1/1] (short) (narrow) %v4776_v7, 8 }
 0x158   :  { %v530_v15 = vpop.permute.xlu0 %529 }
 0x159   :  { %532 = vxpose.xlu0.b32.start.end [1/1] (short) (narrow) %v530_v15, 8 }
 0x16d   :  { %v566_v19 = vpop.permute.xlu1 %565  ;;  %v310_v22 = vpop.permute.xlu0 %309 }
 0x182   :  { %4417 = vset.pattern.permute.xlu0 %v4625_v39  ;;  %v4432_v39 = vld [vmem:[%s5604_s8 + $0x50] sm:$0xff]  }
 0x197   :  { %v291_v21 = vpop.trf.xlu1 }
 0x198   :  { %v315_v23 = vrot.slane %v291_v21, %v4795_v20 }
 0x19a   :  { %v316_v25 = vadd.f32 %v315_v23, %v310_v22 }
 0x19c   :  { %v318_v26 = vmul.f32 0.2, %v316_v25  ;;  %vm317_vm3 = vcmp.gt.f32.partialorder %v316_v25, 0.0 }
 0x19e   :  { %v319_v27 = vsel %vm317_vm3, %v316_v25, %v318_v26 }
 0x19f   :  { %v320_v28 = vsel %vm76_vm2, %v319_v27, -1e+30 }
 0x1a0   :  { %v322_v29 = vsel %vm321_vm4, %v320_v28, -inf }
 0x1a1   :  { %323 = vmax.xlane.f32.xlu0 %v322_v29 }
 0x1d9   :  { %v548_v32 = vpop.trf.xlu0 }
 0x1da   :  { %v571_v33 = vrot.slane %v548_v32, %v4795_v20 }
 0x1dc   :  { %v572_v34 = vadd.f32 %v571_v33, %v566_v19 }
 0x1de   :  { %vm573_vm5 = vcmp.gt.f32.partialorder %v572_v34, 0.0  ;;  %v574_v35 = vmul.f32 0.2, %v572_v34 }
 0x1e0   :  { %v575_v36 = vsel %vm573_vm5, %v572_v34, %v574_v35  ;;  %v4427_v34 = vld [vmem:[%s5603_s7 + $0x40] sm:$0xff]  }
 0x1e1   :  { %v576_v37 = vsel %vm76_vm2, %v575_v36, -1e+30  ;;  %v4428_v35 = vld [vmem:[%s5604_s8 + $0x40] sm:$0xff]   ;;  %v4429_v36 = vld [vmem:[%s5603_s7 + $0x48] sm:$0xff]  }
 0x1e2   :  { %v577_v38 = vsel %vm321_vm4, %v576_v37, -inf }
 0x1e3   :  { %578 = vmax.xlane.f32.xlu1 %v577_v38  ;;  %v4431_v38 = vld [vmem:[%s5603_s7 + $0x50] sm:$0xff]  }
 0x22e   :  { %v324_v40 = vpop.xlane.xlu0 %323 }
 0x22f   :  { %v325_v41 = vsub.f32 %v320_v28, %v324_v40  ;;  %v4433_v40 = vld [vmem:[%s5603_s7 + $0x58] sm:$0xff]  }
 0x231   :  { %v326_v42 = vmul.f32 1.442695, %v325_v41  ;;  %v4434_v41 = vld [vmem:[%s5604_s8 + $0x58] sm:$0xff]  }
 0x233   :  { %4557 = vpow2.f32 %v326_v42  ;;  %v4435_v42 = vld [vmem:[%s5603_s7 + $0x60] sm:$0xff]  }
 0x23d   :  { %v4558_v44 = vpop.eup %4557 }
 0x23e   :  { %v328_v45 = vmul.f32 %v4558_v44, %v4830_v43  ;;  %v4436_v44 = vld [vmem:[%s5604_s8 + $0x60] sm:$0xff]  }
 0x240   :  { %v329_v46 = vsel %vm321_vm4, %v328_v45, 0.0 }
 0x241   :  { %330 = vadd.xlane.f32.xlu1 %v329_v46  ;;  %v4438_v46 = vld [vmem:[%s5604_s8 + $0x68] sm:$0xff]  }
 0x252   :  { %1137 = vrot.lane.b32.xlu1 %v4776_v7, %s4626_s23 }
 0x270   :  { %v579_v53 = vpop.xlane.xlu1 %578 }
 0x271   :  { %v580_v54 = vsub.f32 %v576_v37, %v579_v53  ;;  %v4430_v37 = vld [vmem:[%s5604_s8 + $0x48] sm:$0xff]  }
 0x273   :  { %v581_v55 = vmul.f32 1.442695, %v580_v54 }
 0x275   :  { %4559 = vpow2.f32 %v581_v55 }
 0x27f   :  { %v4560_v56 = vpop.eup %4559 }
 0x280   :  { %v583_v57 = vmul.f32 %v4560_v56, %v4830_v43 }
 0x282   :  { %v584_v58 = vsel %vm321_vm4, %v583_v57, 0.0 }
 0x283   :  { %585 = vadd.xlane.f32.xlu0 %v584_v58 }
 0x299   :  { %1173 = vperm.xlu0 %4417, %v4779_v11  }
 0x2ce   :  { %v331_v10 = vpop.xlane.xlu1 %330 }
 0x2cf   :  { %v332_v12 = vmax.f32 %v331_v10, 1e-20 }
 0x2d1   :  { %4561 = vrcp.f32 %v332_v12 }
 0x2d2   :  { %v1138_v13 = vpop.permute.xlu1 %1137 }
 0x2d3   :  { %1140 = vxpose.xlu1.b32.start.end [1/1] (short) (narrow) %v1138_v13, 8 }
 0x2db   :  { %v4562_v14 = vpop.eup %4561 }
 0x2dc   :  { %v334_v15 = vmul.f32 %v4562_v14, %v328_v45  ;;  %v4437_v45 = vld [vmem:[%s5603_s7 + $0x68] sm:$0xff]  }
 0x2de   :  { %v335_v17 = vpack.c.bf16 %v334_v15, %v334_v15 }
 0x2e0   :  { %4004 = vmatmul.mubr.msk.bf16.vlgmr.msra.gmra.mrb[12].mxu0 %vm321_vm4, %v335_v17 }
 0x2e1   :  { %4014 = vmatpush3.bf16.msra.mxu0 %v4426_v16  ;;  %4015 = vmatprep.mubr.msk.bf16.mxu0 %vm4621_vm1, %v4620_v1 }
 0x2e2   :  { %4025 = vmatprep.subr.bf16.mxu0 %v4620_v1 }
 0x2e8   :  { %4016 = vmatmul.mubr.msk.bf16.vlgmr.msra.gmra.mrb[16].mxu0 %vm87_vm0, %v4760_v4 }
 0x2e9   :  { %4041 = vmatprep.mubr.msk.bf16.mxu0 %vm4621_vm1, %v4620_v1  ;;  %4026 = vmatpush3.bf16.msra.mxu0 %v4427_v34  ;;  %v4449_v34 = vld [vmem:[%s5603_s7 + $0x18] sm:$0xff]  }
 0x2ea   :  { %4027 = vmatprep.subr.bf16.mxu0 %v4620_v1 }
 0x2ed   :  { %4028 = vmatpush3.bf16.msra.mxu0 %v4429_v36  ;;  %v4451_v36 = vld [vmem:[%s5603_s7 + $0x20] sm:$0xff]  }
 0x2ee   :  { %4029 = vmatprep.subr.bf16.mxu0 %v4620_v1 }
 0x2f1   :  { %4030 = vmatpush3.bf16.msra.mxu0 %v4431_v38  ;;  %4418 = vset.pattern.permute.xlu1 %v4628_v51  ;;  %v4454_v38 = vld [vmem:[%s5604_s8 + $0x28] sm:$0xff]  }
 0x2f2   :  { %4031 = vmatprep.subr.bf16.mxu0 %v4620_v1 }
 0x2f5   :  { %4032 = vmatpush3.bf16.msra.mxu0 %v4433_v40  ;;  %v4455_v40 = vld [vmem:[%s5603_s7 + $0x30] sm:$0xff]  }
 0x2f6   :  { %4033 = vmatprep.subr.bf16.mxu0 %v4620_v1 }
 0x2f9   :  { %4034 = vmatpush3.bf16.msra.mxu0 %v4435_v42 }
 0x2fa   :  { %4035 = vmatprep.subr.bf16.mxu0 %v4620_v1 }
 0x2fd   :  { %4036 = vmatpush3.bf16.msra.mxu0 %v4437_v45  ;;  %v4458_v45 = vld [vmem:[%s5604_s8 + $0x38] sm:$0xff]  }
 0x2fe   :  { %4037 = vmatprep.subr.bf16.mxu0 %v4620_v1 }
 0x301   :  { %4038 = vmatpush3.bf16.msra.mxu0 %v4439_v47  ;;  %v4629_v47 = vmov 4  }
 0x302   :  { %4039 = vmatprep.subr.bf16.mxu0 %v4620_v1 }
 0x305   :  { %4040 = vmatpush3.bf16.msra.mxu0 %v4441_v49 }
 0x306   :  { %4045 = vmatprep.subr.bf16.mxu0 %v4620_v1 }
 0x310   :  { %v586_v19 = vpop.xlane.xlu0 %585 }
 0x311   :  { %v587_v21 = vmax.f32 %v586_v19, 1e-20 }
 0x313   :  { %4563 = vrcp.f32 %v587_v21 }
 0x318   :  { %v1174_v28 = vpop.permute.xlu0 %1173 }
 0x31d   :  { %v4564_v22 = vpop.eup %4563 }
 0x31e   :  { %v589_v23 = vmul.f32 %v4564_v22, %v583_v57 }
 0x320   :  { %v590_v25 = vpack.c.bf16 %v589_v23, %v589_v23  ;;  %v4443_v23 = vld [vmem:[%s5603_s7] sm:$0xff]  }
 0x322   :  { %4022 = vmatmul.mubr.msk.bf16.vlgmr.msra.gmra.mrb[8].mxu1 %vm321_vm4, %v590_v25  ;;  %v4444_v25 = vld [vmem:[%s5604_s8] sm:$0xff]  }
 0x323   :  { %4081 = vmatprep.mubr.msk.bf16.mxu1 %vm4621_vm1, %v4620_v1  ;;  %4066 = vmatpush3.bf16.msra.mxu1 %v4428_v35  ;;  %v4450_v35 = vld [vmem:[%s5604_s8 + $0x18] sm:$0xff]  }
 0x324   :  { %4067 = vmatprep.subr.bf16.mxu1 %v4620_v1 }
 0x327   :  { %4068 = vmatpush3.bf16.msra.mxu1 %v4430_v37  ;;  %v4452_v37 = vld [vmem:[%s5604_s8 + $0x20] sm:$0xff]  }
 0x328   :  { %4069 = vmatprep.subr.bf16.mxu1 %v4620_v1 }
 0x32b   :  { %4070 = vmatpush3.bf16.msra.mxu1 %v4432_v39 }
 0x32c   :  { %4071 = vmatprep.subr.bf16.mxu1 %v4620_v1 }
 0x32f   :  { %4072 = vmatpush3.bf16.msra.mxu1 %v4434_v41  ;;  %v4456_v41 = vld [vmem:[%s5604_s8 + $0x30] sm:$0xff]  }
 0x330   :  { %4073 = vmatprep.subr.bf16.mxu1 %v4620_v1 }
 0x333   :  { %4074 = vmatpush3.bf16.msra.mxu1 %v4436_v44  ;;  %v4457_v44 = vld [vmem:[%s5603_s7 + $0x38] sm:$0xff]  }
 0x334   :  { %4075 = vmatprep.subr.bf16.mxu1 %v4620_v1 }
 0x337   :  { %4076 = vmatpush3.bf16.msra.mxu1 %v4438_v46 }
 0x338   :  { %4077 = vmatprep.subr.bf16.mxu1 %v4620_v1 }
 0x33b   :  { %4078 = vmatpush3.bf16.msra.mxu1 %v4440_v48  ;;  %v4459_v48 = vld [vmem:[%s5633_s26 + $0x10] sm:$0xff]  }
 0x33c   :  { %4079 = vmatprep.subr.bf16.mxu1 %v4620_v1 }
 0x33f   :  { %4080 = vmatpush3.bf16.msra.mxu1 %v4442_v50  ;;  %v4460_v50 = vld [vmem:[%s5635_s30 + $0x10] sm:$0xff]  }
 0x340   :  { %4085 = vmatprep.subr.bf16.mxu1 %v4620_v1 }
 0x353   :  { %v1156_v26 = vpop.trf.xlu1 }
 0x354   :  { %v1179_v27 = vrot.slane %v1156_v26, %v4795_v20 }
 0x356   :  { %v1180_v29 = vadd.f32 %v1179_v27, %v1174_v28  ;;  %v3471_v27 = vld [vmem:[%s5636_s5] ss:$0 sm:$0xff]  ;;  %v4445_v28 = vld [vmem:[%s5603_s7 + $0x8] sm:$0xff]  }
 0x358   :  { %vm1181_vm7 = vcmp.gt.f32.partialorder %v1180_v29, 0.0  ;;  %v1182_v30 = vmul.f32 0.2, %v1180_v29 }
 0x35a   :  { %v1183_v31 = vsel %vm1181_vm7, %v1180_v29, %v1182_v30  ;;  %v4446_v29 = vld [vmem:[%s5604_s8 + $0x8] sm:$0xff]  }
 0x35b   :  { %v4861_v32 = vsel %vm76_vm2, %v1183_v31, -1e+30  ;;  %v4447_v31 = vld [vmem:[%s5603_s7 + $0x10] sm:$0xff]  }
 0x35c   :  { %v1185_v33 = vsel %vm321_vm4, %v4861_v32, -inf }
 0x35d   :  { %1186 = vmax.xlane.f32.xlu0 %v1185_v33 }
 0x373   :  { %1571 = vrot.lane.b32.xlu0 %v4776_v7, %s4627_s24 }
 0x3b3   :  { %v378_v52 = vpop.f32.mrb[12].mxu0 }
 0x3b4   :  { %v379_v53 = vadd.f32 %v378_v52, %v4839_v59  ;;  %v4005_v54 = vpop.f32.mrb[13].mxu0 }
 0x3b5   :  { %v381_v55 = vpop.f32.mrb[14].mxu0 }
 0x3b6   :  { %v4006_v56 = vpop.f32.mrb[15].mxu0  ;;  %v391_v30 = vadd.f32 %v3471_v27, %v379_v53 }
 0x3b8   :  { %v393_v33 = vmul.f32 1.442695, %v391_v30  ;;  %vm392_vm9 = vcmp.gt.f32.partialorder %v391_v30, 0.0 }
 0x3bb   :  { %v522_v57 = vpop.f32.mrb[16].mxu0 }
 0x3bc   :  { %v4017_v58 = vpop.f32.mrb[17].mxu0 }
 0x3bd   :  { %v525_v60 = vpop.f32.mrb[18].mxu0 }
 0x3be   :  { %v4018_v61 = vpop.f32.mrb[19].mxu0 }
 0x3ea   :  { %v1187_v62 = vpop.xlane.xlu0 %1186 }
 0x3eb   :  { %v1188_v63 = vsub.f32 %v4861_v32, %v1187_v62  ;;  %v4448_v32 = vld [vmem:[%s5604_s8 + $0x10] sm:$0xff]  }
 0x3ed   :  { %v1189_v0 = vmul.f32 1.442695, %v1188_v63 }
 0x3ee   :  { %v1572_v2 = vpop.permute.xlu0 %1571 }
 0x3ef   :  { %4565 = vpow2.f32 %v1189_v0  ;;  %1574 = vxpose.xlu0.b32.start.end [1/1] (short) (narrow) %v1572_v2, 8 }
 0x3f5   :  { %v632_v3 = vpop.f32.mrb[8].mxu1 }
 0x3f6   :  { %v633_v59 = vadd.f32 %v632_v3, %v522_v57  ;;  %v4023_v9 = vpop.f32.mrb[9].mxu1 }
 0x3f7   :  { %v635_v10 = vpop.f32.mrb[10].mxu1 }
 0x3f8   :  { %v646_v12 = vadd.f32 %v3483_v8, %v633_v59  ;;  %v4024_v13 = vpop.f32.mrb[11].mxu1 }
 0x3f9   :  { %v4566_v14 = vpop.eup %4565 }
 0x3fa   :  { %v648_v15 = vmul.f32 1.442695, %v646_v12  ;;  %v4936_v16 = vmul.f32 %v4566_v14, %v4830_v43  ;;  %vm647_vm8 = vcmp.gt.f32.partialorder %v646_v12, 0.0 }
 0x3fc   :  { %4567 = vpow2.f32 %v648_v15  ;;  %v1192_v17 = vsel %vm321_vm4, %v4936_v16, 0.0 }
 0x3fd   :  { %1193 = vadd.xlane.f32.xlu1 %v1192_v17  ;;  %4569 = vpow2.f32 %v393_v33 }
 0x406   :  { %v4568_v19 = vpop.eup %4567 }
 0x407   :  { %v3484_v21 = vadd.f32 -1.0, %v4568_v19  ;;  %v4570_v39 = vpop.eup %4569 }
 0x408   :  { %v3472_v42 = vadd.f32 -1.0, %v4570_v39  ;;  %v4468_v39 = vld [vmem:[%s5604_s8 + $0x98] sm:$0xff]  }
 0x409   :  { %v651_v22 = vsel %vm647_vm8, %v646_v12, %v3484_v21 }
 0x40a   :  { %v652_v26 = vpack.c.bf16 %v651_v22, %v651_v22  ;;  %v396_v46 = vsel %vm392_vm9, %v391_v30, %v3472_v42  ;;  %v4462_v30 = vld [vmem:[%s5604_s8 + $0x80] sm:$0xff]   ;;  %v4471_v42 = vld [vmem:[%s5603_s7 + $0xa8] sm:$0xff]  }
 0x40b   :  { %v397_v49 = vpack.c.bf16 %v396_v46, %v396_v46  ;;  %v4474_v46 = vld [vmem:[%s5604_s8 + $0xb0] sm:$0xff]  }
 0x40c   :  { %4042 = vmatmul.mubr.bf16.vlgmr.msra.gmra.mrb[20].mxu0 %v652_v26  ;;  %4082 = vmatmul.mubr.bf16.vlgmr.msra.gmra.mrb[12].mxu1 %v652_v26 }
 0x40d   :  { %4046 = vmatpush3.bf16.msra.mxu0 %v4443_v23  ;;  %4086 = vmatpush3.bf16.msra.mxu1 %v4444_v25 }
 0x40e   :  { %1607 = vperm.xlu1 %4418, %v4779_v11   ;;  %4047 = vmatprep.subr.bf16.mxu0 %v4620_v1 }
 0x40f   :  { %4087 = vmatprep.subr.bf16.mxu1 %v4620_v1  ;;  %4061 = vmatprep.mubr.msk.bf16.mxu0 %vm4621_vm1, %v4620_v1 }
 0x410   :  { %4101 = vmatprep.mubr.msk.bf16.mxu1 %vm4621_vm1, %v4620_v1 }
 0x411   :  { %4048 = vmatpush3.bf16.msra.mxu0 %v4445_v28  ;;  %4088 = vmatpush3.bf16.msra.mxu1 %v4446_v29  ;;  %v4461_v29 = vld [vmem:[%s5603_s7 + $0x80] sm:$0xff]  }
 0x412   :  { %4049 = vmatprep.subr.bf16.mxu0 %v4620_v1  ;;  %4089 = vmatprep.subr.bf16.mxu1 %v4620_v1 }
 0x413   :  { %4419 = vset.pattern.permute.xlu1 %v4629_v47  ;;  %v4475_v47 = vld [vmem:[%s5603_s7 + $0xb8] sm:$0xff]  }
 0x415   :  { %4050 = vmatpush3.bf16.msra.mxu0 %v4447_v31  ;;  %4090 = vmatpush3.bf16.msra.mxu1 %v4448_v32  ;;  %v4463_v31 = vld [vmem:[%s5603_s7 + $0x88] sm:$0xff]  }
 0x416   :  { %4051 = vmatprep.subr.bf16.mxu0 %v4620_v1  ;;  %4091 = vmatprep.subr.bf16.mxu1 %v4620_v1  ;;  %v4464_v32 = vld [vmem:[%s5604_s8 + $0x88] sm:$0xff]  }
 0x418   :  { %4420 = vset.pattern.permute.xlu0 %v4622_v5  ;;  %v4453_v5 = vld [vmem:[%s5603_s7 + $0x28] sm:$0xff]  }
 0x419   :  { %4052 = vmatpush3.bf16.msra.mxu0 %v4449_v34  ;;  %4092 = vmatpush3.bf16.msra.mxu1 %v4450_v35  ;;  %v4465_v35 = vld [vmem:[%s5603_s7 + $0x90] sm:$0xff]  }
 0x41a   :  { %4053 = vmatprep.subr.bf16.mxu0 %v4620_v1  ;;  %4093 = vmatprep.subr.bf16.mxu1 %v4620_v1 }
 0x41d   :  { %4054 = vmatpush3.bf16.msra.mxu0 %v4451_v36  ;;  %4094 = vmatpush3.bf16.msra.mxu1 %v4452_v37  ;;  %v4466_v36 = vld [vmem:[%s5604_s8 + $0x90] sm:$0xff]  }
 0x41e   :  { %4055 = vmatprep.subr.bf16.mxu0 %v4620_v1  ;;  %4095 = vmatprep.subr.bf16.mxu1 %v4620_v1 }
 0x421   :  { %4056 = vmatpush3.bf16.msra.mxu0 %v4453_v5  ;;  %4096 = vmatpush3.bf16.msra.mxu1 %v4454_v38  ;;  %v4467_v38 = vld [vmem:[%s5603_s7 + $0x98] sm:$0xff]  }
 0x422   :  { %4057 = vmatprep.subr.bf16.mxu0 %v4620_v1  ;;  %4097 = vmatprep.subr.bf16.mxu1 %v4620_v1 }
 0x425   :  { %4058 = vmatpush3.bf16.msra.mxu0 %v4455_v40  ;;  %4098 = vmatpush3.bf16.msra.mxu1 %v4456_v41  ;;  %v4469_v40 = vld [vmem:[%s5603_s7 + $0xa0] sm:$0xff]  }
 0x426   :  { %4059 = vmatprep.subr.bf16.mxu0 %v4620_v1  ;;  %4099 = vmatprep.subr.bf16.mxu1 %v4620_v1  ;;  %v4470_v41 = vld [vmem:[%s5604_s8 + $0xa0] sm:$0xff]  }
 0x429   :  { %4060 = vmatpush3.bf16.msra.mxu0 %v4457_v44  ;;  %4100 = vmatpush3.bf16.msra.mxu1 %v4458_v45  ;;  %v4472_v44 = vld [vmem:[%s5604_s8 + $0xa8] sm:$0xff]   ;;  %v4473_v45 = vld [vmem:[%s5603_s7 + $0xb0] sm:$0xff]  }
 0x42a   :  { %4105 = vmatprep.subr.bf16.mxu0 %v4620_v1  ;;  %4111 = vmatprep.subr.bf16.mxu1 %v4620_v1 }
 0x42c   :  { %4062 = vmatmul.mubr.bf16.vlgmr.msra.gmra.mrb[20].mxu0 %v397_v49  ;;  %4102 = vmatmul.mubr.bf16.vlgmr.msra.gmra.mrb[16].mxu1 %v397_v49 }
 0x42d   :  { %4106 = vmatpush3.bf16.msra.mxu0 %v4459_v48  ;;  %4107 = vmatprep.mubr.msk.bf16.mxu0 %vm4621_vm1, %v4620_v1  ;;  %v4476_v48 = vld [vmem:[%s5604_s8 + $0xb8] sm:$0xff]  }
 0x42e   :  { %4113 = vmatprep.mubr.msk.bf16.mxu1 %vm4621_vm1, %v4620_v1  ;;  %4117 = vmatprep.subr.bf16.mxu0 %v4620_v1 }
 0x42f   :  { %4112 = vmatpush3.bf16.msra.mxu1 %v4460_v50 }
 0x430   :  { %4143 = vmatprep.subr.bf16.mxu1 %v4620_v1 }
 0x434   :  { %4108 = vmatmul.mubr.msk.bf16.vlgmr.msra.gmra.mrb[24].mxu0 %vm87_vm0, %v4760_v4  ;;  %4114 = vmatmul.mubr.msk.bf16.vlgmr.msra.gmra.mrb[20].mxu1 %vm87_vm0, %v4760_v4 }
 0x435   :  { %4119 = vmatprep.mubr.msk.bf16.mxu0 %vm4621_vm1, %v4620_v1  ;;  %4159 = vmatprep.mubr.msk.bf16.mxu1 %vm4621_vm1, %v4620_v1 }
 0x436   :  { %4144 = vmatpush3.bf16.msra.mxu1 %v4462_v30 }
 0x437   :  { %4145 = vmatprep.subr.bf16.mxu1 %v4620_v1 }
 0x43a   :  { %4146 = vmatpush3.bf16.msra.mxu1 %v4464_v32 }
 0x43b   :  { %4147 = vmatprep.subr.bf16.mxu1 %v4620_v1 }
 0x43e   :  { %4148 = vmatpush3.bf16.msra.mxu1 %v4466_v36 }
 0x43f   :  { %4149 = vmatprep.subr.bf16.mxu1 %v4620_v1 }
 0x442   :  { %4150 = vmatpush3.bf16.msra.mxu1 %v4468_v39 }
 0x443   :  { %4151 = vmatprep.subr.bf16.mxu1 %v4620_v1 }
 0x446   :  { %4152 = vmatpush3.bf16.msra.mxu1 %v4470_v41  ;;  %v4483_v41 = vld [vmem:[%s5603_s7 + $0xd0] sm:$0xff]  }
 0x447   :  { %4153 = vmatprep.subr.bf16.mxu1 %v4620_v1 }
 0x44a   :  { %4154 = vmatpush3.bf16.msra.mxu1 %v4472_v44 }
 0x44b   :  { %4155 = vmatprep.subr.bf16.mxu1 %v4620_v1 }
 0x44e   :  { %4156 = vmatpush3.bf16.msra.mxu1 %v4474_v46  ;;  %v4485_v46 = vld [vmem:[%s5603_s7 + $0xd8] sm:$0xff]  }
 0x44f   :  { %4157 = vmatprep.subr.bf16.mxu1 %v4620_v1 }
 0x452   :  { %4158 = vmatpush3.bf16.msra.mxu1 %v4476_v48  ;;  %v4487_v48 = vld [vmem:[%s5603_s7 + $0xe0] sm:$0xff]  }
 0x453   :  { %4163 = vmatprep.subr.bf16.mxu1 %v4620_v1 }
 0x46f   :  { %v1590_v51 = vpop.trf.xlu0 }
 0x470   :  { %v1613_v53 = vrot.slane %v1590_v51, %v4795_v20 }
 0x48a   :  { %v1194_v52 = vpop.xlane.xlu1 %1193 }
 0x48b   :  { %v1195_v2 = vmax.f32 %v1194_v52, 1e-20 }
 0x48d   :  { %4571 = vrcp.f32 %v1195_v2 }
 0x48e   :  { %v1608_v54 = vpop.permute.xlu1 %1607 }
 0x48f   :  { %v1614_v55 = vadd.f32 %v1613_v53, %v1608_v54 }
 0x491   :  { %v1616_v56 = vmul.f32 0.2, %v1614_v55  ;;  %vm1615_vm10 = vcmp.gt.f32.partialorder %v1614_v55, 0.0 }
 0x493   :  { %v1617_v57 = vsel %vm1615_vm10, %v1614_v55, %v1616_v56 }
 0x494   :  { %v1618_v58 = vsel %vm76_vm2, %v1617_v57, -1e+30 }
 0x495   :  { %v1619_v60 = vsel %vm321_vm4, %v1618_v58, -inf }
 0x496   :  { %1620 = vmax.xlane.f32.xlu1 %v1619_v60 }
 0x497   :  { %v4572_v12 = vpop.eup %4571 }
 0x498   :  { %v1197_v14 = vmul.f32 %v4572_v12, %v4936_v16 }
 0x49a   :  { %v1198_v21 = vpack.c.bf16 %v1197_v14, %v1197_v14 }
 0x4a7   :  { %2005 = vrot.lane.b32.xlu1 %v4776_v7, %s4630_s28 }
 0x4ab   :  { %2041 = vperm.xlu1 %4419, %v4779_v11  }
 0x4df   :  { %v945_v61 = vpop.f32.mrb[12].mxu1 }
 0x4e0   :  { %v4083_v62 = vpop.f32.mrb[13].mxu1 }
 0x4e1   :  { %v948_v63 = vpop.f32.mrb[14].mxu1 }
 0x4e2   :  { %v4084_v0 = vpop.f32.mrb[15].mxu1 }
 0x4ff   :  { %v1033_v3 = vpop.f32.mrb[16].mxu1 }
 0x500   :  { %v5039_v8 = vadd.f32 %v1033_v3, %v945_v61  ;;  %v4103_v59 = vpop.f32.mrb[17].mxu1 }
 0x501   :  { %v1036_v9 = vpop.f32.mrb[18].mxu1 }
 0x502   :  { %v4104_v10 = vpop.f32.mrb[19].mxu1 }
 0x503   :  { %v4477_v10 = vld [vmem:[%s5633_s26 + $0x18] sm:$0xff]  }
 0x507   :  { %v1082_v13 = vpop.f32.mrb[24].mxu0  ;;  %v1131_v33 = vpop.f32.mrb[20].mxu1 }
 0x508   :  { %v1199_v15 = vpack.c.bf16 %v1082_v13, %v1082_v13  ;;  %v4109_v7 = vpop.f32.mrb[25].mxu0  ;;  %v4115_v34 = vpop.f32.mrb[21].mxu1 }
 0x509   :  { %v1085_v17 = vpop.f32.mrb[26].mxu0  ;;  %v1134_v37 = vpop.f32.mrb[22].mxu1 }
 0x50a   :  { %v1204_v11 = vsel %vm340_vm6, %v1199_v15, 0  ;;  %v4110_v19 = vpop.f32.mrb[27].mxu0  ;;  %v4116_v5 = vpop.f32.mrb[23].mxu1 }
 0x50b   :  { %4118 = vmatpush3.bf16.msra.mxu0 %v1204_v11 }
 0x50c   :  { %4123 = vmatprep.subr.bf16.mxu0 %v4620_v1 }
 0x50e   :  { %4120 = vmatmul.mubr.msk.bf16.vlgmr.msra.gmra.mrb[28].mxu0 %vm321_vm4, %v1198_v21  ;;  %v4478_v21 = vld [vmem:[%s5635_s30 + $0x18] sm:$0xff]  }
 0x50f   :  { %4139 = vmatprep.mubr.msk.bf16.mxu0 %vm4621_vm1, %v4620_v1  ;;  %4124 = vmatpush3.bf16.msra.mxu0 %v4461_v29 }
 0x510   :  { %4125 = vmatprep.subr.bf16.mxu0 %v4620_v1 }
 0x513   :  { %4126 = vmatpush3.bf16.msra.mxu0 %v4463_v31 }
 0x514   :  { %4127 = vmatprep.subr.bf16.mxu0 %v4620_v1 }
 0x517   :  { %4128 = vmatpush3.bf16.msra.mxu0 %v4465_v35 }
 0x518   :  { %4129 = vmatprep.subr.bf16.mxu0 %v4620_v1 }
 0x51b   :  { %4130 = vmatpush3.bf16.msra.mxu0 %v4467_v38  ;;  %v4480_v38 = vld [vmem:[%s5604_s8 + $0xc0] sm:$0xff]  }
 0x51c   :  { %4131 = vmatprep.subr.bf16.mxu0 %v4620_v1 }
 0x51f   :  { %4132 = vmatpush3.bf16.msra.mxu0 %v4469_v40 }
 0x520   :  { %4133 = vmatprep.subr.bf16.mxu0 %v4620_v1 }
 0x523   :  { %v1621_v22 = vpop.xlane.xlu1 %1620  ;;  %4134 = vmatpush3.bf16.msra.mxu0 %v4471_v42  ;;  %v4484_v42 = vld [vmem:[%s5604_s8 + $0xd0] sm:$0xff]  }
 0x524   :  { %v1622_v23 = vsub.f32 %v1618_v58, %v1621_v22  ;;  %4135 = vmatprep.subr.bf16.mxu0 %v4620_v1  ;;  %v3559_v58 = vld [vmem:[%s5636_s5 + $0x2] ss:$0 sm:$0xff] }
 0x525   :  { %v4479_v22 = vld [vmem:[%s5603_s7 + $0xc0] sm:$0xff]  }
 0x526   :  { %v1623_v25 = vmul.f32 1.442695, %v1622_v23  ;;  %v4481_v23 = vld [vmem:[%s5603_s7 + $0xc8] sm:$0xff]  }
 0x527   :  { %v2006_v26 = vpop.permute.xlu1 %2005  ;;  %4136 = vmatpush3.bf16.msra.mxu0 %v4473_v45 }
 0x528   :  { %4573 = vpow2.f32 %v1623_v25  ;;  %2008 = vxpose.xlu1.b32.start.end [1/1] (short) (narrow) %v2006_v26, 8  ;;  %4137 = vmatprep.subr.bf16.mxu0 %v4620_v1 }
 0x52b   :  { %4138 = vmatpush3.bf16.msra.mxu0 %v4475_v47  ;;  %v2042_v49 = vpop.permute.xlu1 %2041  ;;  %v4486_v47 = vld [vmem:[%s5604_s8 + $0xd8] sm:$0xff]  }
 0x52c   :  { %4169 = vmatprep.subr.bf16.mxu0 %v4620_v1 }
 0x532   :  { %v4574_v16 = vpop.eup %4573 }
 0x533   :  { %v5048_v27 = vmul.f32 %v4574_v16, %v4830_v43 }
 0x535   :  { %v1626_v28 = vsel %vm321_vm4, %v5048_v27, 0.0 }
 0x536   :  { %1627 = vadd.xlane.f32.xlu0 %v1626_v28 }
 0x5a8   :  { %v2024_v50 = vpop.trf.xlu1 }
 0x5a9   :  { %v2047_v51 = vrot.slane %v2024_v50, %v4795_v20  ;;  %v4489_v50 = vld [vmem:[%s5603_s7 + $0xe8] sm:$0xff]  }
 0x5ab   :  { %v2048_v52 = vadd.f32 %v2047_v51, %v2042_v49  ;;  %v4488_v49 = vld [vmem:[%s5604_s8 + $0xe0] sm:$0xff]   ;;  %v4490_v51 = vld [vmem:[%s5604_s8 + $0xe8] sm:$0xff]  }
 0x5ad   :  { %vm2049_vm11 = vcmp.gt.f32.partialorder %v2048_v52, 0.0  ;;  %v2050_v53 = vmul.f32 0.2, %v2048_v52 }
 0x5af   :  { %v2051_v54 = vsel %vm2049_vm11, %v2048_v52, %v2050_v53  ;;  %v4491_v52 = vld [vmem:[%s5603_s7 + $0xf0] sm:$0xff]  }
 0x5b0   :  { %v2052_v55 = vsel %vm76_vm2, %v2051_v54, -1e+30  ;;  %v4492_v53 = vld [vmem:[%s5604_s8 + $0xf0] sm:$0xff]   ;;  %v4493_v54 = vld [vmem:[%s5603_s7 + $0xf8] sm:$0xff]  }
 0x5b1   :  { %v2053_v56 = vsel %vm321_vm4, %v2052_v55, -inf }
 0x5b2   :  { %2054 = vmax.xlane.f32.xlu0 %v2053_v56 }
 0x5c3   :  { %v1628_v13 = vpop.xlane.xlu0 %1627 }
 0x5c4   :  { %v1629_v25 = vmax.f32 %v1628_v13, 1e-20  ;;  %v4498_v13 = vld [vmem:[%s5604_s8 + $0x100] sm:$0xff]  }
 0x5e1   :  { %v1240_v57 = vpop.f32.mrb[28].mxu0 }
 0x5e2   :  { %v1241_v60 = vadd.f32 %v1240_v57, %v1131_v33  ;;  %v4121_v61 = vpop.f32.mrb[29].mxu0  ;;  %v3619_v57 = vld [vmem:[%s5636_s5 + $0x3] ss:$0 sm:$0xff] }
 0x5e3   :  { %v1243_v62 = vpop.f32.mrb[30].mxu0 }
 0x5e4   :  { %v1254_v63 = vadd.f32 %v3559_v58, %v1241_v60  ;;  %v4122_v0 = vpop.f32.mrb[31].mxu0 }
 0x5e6   :  { %v1256_v2 = vmul.f32 1.442695, %v1254_v63  ;;  %vm1255_vm12 = vcmp.gt.f32.partialorder %v1254_v63, 0.0 }
 0x5e8   :  { %4575 = vpow2.f32 %v1256_v2 }
 0x5f2   :  { %v4576_v3 = vpop.eup %4575 }
 0x5f3   :  { %v3560_v59 = vadd.f32 -1.0, %v4576_v3 }
 0x5f5   :  { %v1259_v9 = vsel %vm1255_vm12, %v1254_v63, %v3560_v59 }
 0x5f6   :  { %v1260_v12 = vpack.c.bf16 %v1259_v9, %v1259_v9  ;;  %v4495_v9 = vld [vmem:[%s5633_s26 + $0x20] sm:$0xff]  }
 0x5f8   :  { %4140 = vmatmul.mubr.bf16.vlgmr.msra.gmra.mrb[20].mxu0 %v1260_v12  ;;  %4160 = vmatmul.mubr.bf16.vlgmr.msra.gmra.mrb[24].mxu1 %v1260_v12  ;;  %v4496_v12 = vld [vmem:[%s5635_s30 + $0x20] sm:$0xff]  }
 0x5f9   :  { %4164 = vmatpush3.bf16.msra.mxu1 %v4477_v10  ;;  %4165 = vmatprep.mubr.msk.bf16.mxu1 %vm4621_vm1, %v4620_v1 }
 0x5fa   :  { %4171 = vmatprep.mubr.msk.bf16.mxu0 %vm4621_vm1, %v4620_v1  ;;  %4175 = vmatprep.subr.bf16.mxu1 %v4620_v1 }
 0x5fb   :  { %4170 = vmatpush3.bf16.msra.mxu0 %v4478_v21 }
 0x5fc   :  { %4181 = vmatprep.subr.bf16.mxu0 %v4620_v1 }
 0x600   :  { %4166 = vmatmul.mubr.msk.bf16.vlgmr.msra.gmra.mrb[28].mxu1 %vm87_vm0, %v4760_v4  ;;  %4172 = vmatmul.mubr.msk.bf16.vlgmr.msra.gmra.mrb[32].mxu0 %vm87_vm0, %v4760_v4 }
 0x601   :  { %4177 = vmatprep.mubr.msk.bf16.mxu1 %vm4621_vm1, %v4620_v1  ;;  %4197 = vmatprep.mubr.msk.bf16.mxu0 %vm4621_vm1, %v4620_v1 }
 0x602   :  { %4182 = vmatpush3.bf16.msra.mxu0 %v4479_v22 }
 0x603   :  { %4183 = vmatprep.subr.bf16.mxu0 %v4620_v1 }
 0x606   :  { %4184 = vmatpush3.bf16.msra.mxu0 %v4481_v23 }
 0x607   :  { %4185 = vmatprep.subr.bf16.mxu0 %v4620_v1 }
 0x60a   :  { %4186 = vmatpush3.bf16.msra.mxu0 %v4483_v41  ;;  %v4506_v41 = vld [vmem:[%s5604_s8 + $0x120] sm:$0xff]  }
 0x60b   :  { %4187 = vmatprep.subr.bf16.mxu0 %v4620_v1 }
 0x60e   :  { %4188 = vmatpush3.bf16.msra.mxu0 %v4485_v46  ;;  %v4510_v46 = vld [vmem:[%s5604_s8 + $0x130] sm:$0xff]  }
 0x60f   :  { %4189 = vmatprep.subr.bf16.mxu0 %v4620_v1 }
 0x612   :  { %4190 = vmatpush3.bf16.msra.mxu0 %v4487_v48  ;;  %v4512_v48 = vld [vmem:[%s5604_s8 + $0x138] sm:$0xff]  }
 0x613   :  { %4191 = vmatprep.subr.bf16.mxu0 %v4620_v1 }
 0x616   :  { %4192 = vmatpush3.bf16.msra.mxu0 %v4489_v50  ;;  %v3679_v50 = vld [vmem:[%s5636_s5 + $0x4] ss:$0 sm:$0xff] }
 0x617   :  { %4193 = vmatprep.subr.bf16.mxu0 %v4620_v1 }
 0x61a   :  { %4194 = vmatpush3.bf16.msra.mxu0 %v4491_v52 }
 0x61b   :  { %4195 = vmatprep.subr.bf16.mxu0 %v4620_v1 }
 0x61e   :  { %4196 = vmatpush3.bf16.msra.mxu0 %v4493_v54 }
 0x61f   :  { %4221 = vmatprep.subr.bf16.mxu0 %v4620_v1 }
 0x63f   :  { %v2055_v14 = vpop.xlane.xlu0 %2054 }
 0x640   :  { %v2056_v15 = vsub.f32 %v2052_v55, %v2055_v14  ;;  %v4494_v55 = vld [vmem:[%s5604_s8 + $0xf8] sm:$0xff]   ;;  %v4500_v14 = vld [vmem:[%s5604_s8 + $0x108] sm:$0xff]  }
 0x642   :  { %v2057_v7 = vmul.f32 1.442695, %v2056_v15 }
 0x644   :  { %4577 = vpow2.f32 %v2057_v7 }
 0x645   :  { %4579 = vrcp.f32 %v1629_v25 }
 0x64e   :  { %v4578_v17 = vpop.eup %4577 }
 0x64f   :  { %v5136_v11 = vmul.f32 %v4578_v17, %v4830_v43  ;;  %v4580_v31 = vpop.eup %4579 }
 0x650   :  { %v1631_v33 = vmul.f32 %v4580_v31, %v5048_v27  ;;  %v4482_v27 = vld [vmem:[%s5604_s8 + $0xc8] sm:$0xff]  }
 0x651   :  { %v2060_v19 = vsel %vm321_vm4, %v5136_v11, 0.0 }
 0x652   :  { %2061 = vadd.xlane.f32.xlu0 %v2060_v19 }
 0x6cb   :  { %v1466_v26 = vpop.f32.mrb[24].mxu1 }
 0x6cc   :  { %v5157_v16 = vadd.f32 %v1466_v26, %v5039_v8  ;;  %v4161_v28 = vpop.f32.mrb[25].mxu1  ;;  %v1632_v8 = vpack.c.bf16 %v1631_v33, %v1631_v33 }
 0x6cd   :  { %v1469_v29 = vpop.f32.mrb[26].mxu1 }
 0x6ce   :  { %v4162_v30 = vpop.f32.mrb[27].mxu1 }
 0x6d3   :  { %v1516_v32 = vpop.f32.mrb[28].mxu1  ;;  %v1565_v39 = vpop.f32.mrb[32].mxu0 }
 0x6d4   :  { %v1633_v34 = vpack.c.bf16 %v1516_v32, %v1516_v32  ;;  %v4167_v35 = vpop.f32.mrb[29].mxu1  ;;  %v4173_v40 = vpop.f32.mrb[33].mxu0 }
 0x6d5   :  { %v1519_v36 = vpop.f32.mrb[30].mxu1  ;;  %v1568_v44 = vpop.f32.mrb[34].mxu0  ;;  %v4505_v40 = vld [vmem:[%s5603_s7 + $0x120] sm:$0xff]  }
 0x6d6   :  { %v1638_v37 = vsel %vm340_vm6, %v1633_v34, 0  ;;  %v4168_v5 = vpop.f32.mrb[31].mxu1  ;;  %v4174_v45 = vpop.f32.mrb[35].mxu0  ;;  %v4497_v34 = vld [vmem:[%s5603_s7 + $0x100] sm:$0xff]   ;;  %v4508_v44 = vld [vmem:[%s5604_s8 + $0x128] sm:$0xff]  }
 0x6d7   :  { %4176 = vmatpush3.bf16.msra.mxu1 %v1638_v37  ;;  %v4501_v37 = vld [vmem:[%s5603_s7 + $0x110] sm:$0xff]  }
 0x6d8   :  { %4201 = vmatprep.subr.bf16.mxu1 %v4620_v1  ;;  %v4502_v5 = vld [vmem:[%s5604_s8 + $0x110] sm:$0xff]  }
 0x6d9   :  { %v4509_v45 = vld [vmem:[%s5603_s7 + $0x130] sm:$0xff]  }
 0x6da   :  { %4178 = vmatmul.mubr.msk.bf16.vlgmr.msra.gmra.mrb[32].mxu1 %vm321_vm4, %v1632_v8 }
 0x6db   :  { %4202 = vmatpush3.bf16.msra.mxu1 %v4480_v38  ;;  %4217 = vmatprep.mubr.msk.bf16.mxu1 %vm4621_vm1, %v4620_v1 }
 0x6dc   :  { %4203 = vmatprep.subr.bf16.mxu1 %v4620_v1 }
 0x6df   :  { %4204 = vmatpush3.bf16.msra.mxu1 %v4482_v27  ;;  %v2062_v15 = vpop.xlane.xlu0 %2061  ;;  %v4503_v27 = vld [vmem:[%s5603_s7 + $0x118] sm:$0xff]  }
 0x6e0   :  { %4205 = vmatprep.subr.bf16.mxu1 %v4620_v1  ;;  %v2063_v7 = vmax.f32 %v2062_v15, 1e-20 }
 0x6e3   :  { %4206 = vmatpush3.bf16.msra.mxu1 %v4484_v42  ;;  %v4507_v42 = vld [vmem:[%s5603_s7 + $0x128] sm:$0xff]  }
 0x6e4   :  { %4207 = vmatprep.subr.bf16.mxu1 %v4620_v1 }
 0x6e7   :  { %4208 = vmatpush3.bf16.msra.mxu1 %v4486_v47  ;;  %v4511_v47 = vld [vmem:[%s5603_s7 + $0x138] sm:$0xff]  }
 0x6e8   :  { %4209 = vmatprep.subr.bf16.mxu1 %v4620_v1 }
 0x6eb   :  { %4210 = vmatpush3.bf16.msra.mxu1 %v4488_v49 }
 0x6ec   :  { %4211 = vmatprep.subr.bf16.mxu1 %v4620_v1 }
 0x6ef   :  { %4212 = vmatpush3.bf16.msra.mxu1 %v4490_v51 }
 0x6f0   :  { %4213 = vmatprep.subr.bf16.mxu1 %v4620_v1 }
 0x6f3   :  { %4214 = vmatpush3.bf16.msra.mxu1 %v4492_v53 }
 0x6f4   :  { %4215 = vmatprep.subr.bf16.mxu1 %v4620_v1 }
 0x6f7   :  { %4216 = vmatpush3.bf16.msra.mxu1 %v4494_v55 }
 0x6f8   :  { %4227 = vmatprep.subr.bf16.mxu1 %v4620_v1 }
 0x7ad   :  { %v1674_v56 = vpop.f32.mrb[32].mxu1 }
 0x7ae   :  { %v1675_v58 = vadd.f32 %v1674_v56, %v1565_v39  ;;  %v4179_v60 = vpop.f32.mrb[33].mxu1  ;;  %v4504_v39 = vld [vmem:[%s5604_s8 + $0x118] sm:$0xff]  }
 0x7af   :  { %v1677_v61 = vpop.f32.mrb[34].mxu1 }
 0x7b0   :  { %v1688_v62 = vadd.f32 %v3619_v57, %v1675_v58  ;;  %v4180_v63 = vpop.f32.mrb[35].mxu1 }
 0x7b2   :  { %v1690_v0 = vmul.f32 1.442695, %v1688_v62  ;;  %vm1689_vm13 = vcmp.gt.f32.partialorder %v1688_v62, 0.0 }
 0x7b4   :  { %4581 = vpow2.f32 %v1690_v0 }
 0x7b5   :  { %4583 = vrcp.f32 %v2063_v7 }
 0x7be   :  { %v4582_v2 = vpop.eup %4581 }
 0x7bf   :  { %v3620_v3 = vadd.f32 -1.0, %v4582_v2  ;;  %v4584_v25 = vpop.eup %4583 }
 0x7c0   :  { %v2065_v28 = vmul.f32 %v4584_v25, %v5136_v11  ;;  %v4499_v11 = vld [vmem:[%s5603_s7 + $0x108] sm:$0xff]  }
 0x7c1   :  { %v1693_v59 = vsel %vm1689_vm13, %v1688_v62, %v3620_v3  ;;  %v2342_v62 = vld [vmem:[%s5605_s9] sm:$0xf] }
 0x7c2   :  { %v1694_v10 = vpack.c.bf16 %v1693_v59, %v1693_v59  ;;  %v2347_v63 = vsel %vm340_vm6, %v2342_v62, 0  ;;  %v4520_v62 = vld [vmem:[%s5609_s13 + $0x8] sm:$0xff]  }
 0x7c4   :  { %4198 = vmatmul.mubr.bf16.vlgmr.msra.gmra.mrb[20].mxu0 %v1694_v10  ;;  %4218 = vmatmul.mubr.bf16.vlgmr.msra.gmra.mrb[36].mxu1 %v1694_v10 }
 0x7c5   :  { %4222 = vmatpush3.bf16.msra.mxu0 %v4495_v9  ;;  %4223 = vmatprep.mubr.msk.bf16.mxu0 %vm4621_vm1, %v4620_v1 }
 0x7c6   :  { %4229 = vmatprep.mubr.msk.bf16.mxu1 %vm4621_vm1, %v4620_v1  ;;  %4233 = vmatprep.subr.bf16.mxu0 %v4620_v1 }
 0x7c7   :  { %4228 = vmatpush3.bf16.msra.mxu1 %v4496_v12 }
 0x7c8   :  { %4259 = vmatprep.subr.bf16.mxu1 %v4620_v1 }
 0x7cc   :  { %4224 = vmatmul.mubr.msk.bf16.vlgmr.msra.gmra.mrb[36].mxu0 %vm87_vm0, %v4760_v4  ;;  %4230 = vmatmul.mubr.msk.bf16.vlgmr.msra.gmra.mrb[40].mxu1 %vm87_vm0, %v4760_v4 }
 0x7cd   :  { %4235 = vmatprep.mubr.msk.bf16.mxu0 %vm4621_vm1, %v4620_v1  ;;  %4275 = vmatprep.mubr.msk.bf16.mxu1 %vm4621_vm1, %v4620_v1 }
 0x7ce   :  { %4260 = vmatpush3.bf16.msra.mxu1 %v4498_v13 }
 0x7cf   :  { %4261 = vmatprep.subr.bf16.mxu1 %v4620_v1 }
 0x7d2   :  { %4262 = vmatpush3.bf16.msra.mxu1 %v4500_v14 }
 0x7d3   :  { %4263 = vmatprep.subr.bf16.mxu1 %v4620_v1 }
 0x7d6   :  { %4264 = vmatpush3.bf16.msra.mxu1 %v4502_v5  ;;  %v4515_v5 = vld [vmem:[%s5607_s11 + $0x4] ss:$12 sps:$4 sm:$0xff]  }
 0x7d7   :  { %4265 = vmatprep.subr.bf16.mxu1 %v4620_v1 }
 0x7da   :  { %4266 = vmatpush3.bf16.msra.mxu1 %v4504_v39 }
 0x7db   :  { %4267 = vmatprep.subr.bf16.mxu1 %v4620_v1 }
 0x7de   :  { %4268 = vmatpush3.bf16.msra.mxu1 %v4506_v41 }
 0x7df   :  { %4269 = vmatprep.subr.bf16.mxu1 %v4620_v1 }
 0x7e2   :  { %4270 = vmatpush3.bf16.msra.mxu1 %v4508_v44 }
 0x7e3   :  { %4271 = vmatprep.subr.bf16.mxu1 %v4620_v1 }
 0x7e6   :  { %4272 = vmatpush3.bf16.msra.mxu1 %v4510_v46 }
 0x7e7   :  { %4273 = vmatprep.subr.bf16.mxu1 %v4620_v1 }
 0x7ea   :  { %4274 = vmatpush3.bf16.msra.mxu1 %v4512_v48 }
 0x7eb   :  { %4279 = vmatprep.subr.bf16.mxu1 %v4620_v1 }
 0x897   :  { %v1900_v17 = vpop.f32.mrb[36].mxu1 }
 0x898   :  { %v5253_v19 = vadd.f32 %v1900_v17, %v5157_v16  ;;  %v4219_v21 = vpop.f32.mrb[37].mxu1  ;;  %v2066_v16 = vpack.c.bf16 %v2065_v28, %v2065_v28 }
 0x899   :  { %v1903_v22 = vpop.f32.mrb[38].mxu1 }
 0x89a   :  { %v4220_v23 = vpop.f32.mrb[39].mxu1 }
 0x89f   :  { %v1950_v26 = vpop.f32.mrb[36].mxu0  ;;  %v1999_v35 = vpop.f32.mrb[40].mxu1 }
 0x8a0   :  { %v2067_v29 = vpack.c.bf16 %v1950_v26, %v1950_v26  ;;  %v4225_v30 = vpop.f32.mrb[37].mxu0  ;;  %v4231_v36 = vpop.f32.mrb[41].mxu1 }
 0x8a1   :  { %v1953_v31 = vpop.f32.mrb[38].mxu0  ;;  %v2002_v38 = vpop.f32.mrb[42].mxu1 }
 0x8a2   :  { %v2072_v32 = vsel %vm340_vm6, %v2067_v29, 0  ;;  %v4226_v33 = vpop.f32.mrb[39].mxu0  ;;  %v4232_v8 = vpop.f32.mrb[43].mxu1  ;;  %v4513_v38 = vld [vmem:[%s5607_s11] ss:$12 sps:$4 sm:$0xff]  }
 0x8a3   :  { %4234 = vmatpush3.bf16.msra.mxu0 %v2072_v32  ;;  %v4595_v33 = vld [vmem:[%s5634_s3] sm:$0xff] }
 0x8a4   :  { %4239 = vmatprep.subr.bf16.mxu0 %v4620_v1 }
 0x8a6   :  { %4236 = vmatmul.mubr.msk.bf16.vlgmr.msra.gmra.mrb[40].mxu0 %vm321_vm4, %v2066_v16 }
 0x8a7   :  { %4240 = vmatpush3.bf16.msra.mxu0 %v4497_v34  ;;  %4255 = vmatprep.mubr.msk.bf16.mxu0 %vm4621_vm1, %v4620_v1  ;;  %v2502_v34 = vsel %vm321_vm4, %v4595_v33, 0.0 }
 0x8a8   :  { %4241 = vmatprep.subr.bf16.mxu0 %v4620_v1 }
 0x8ab   :  { %4242 = vmatpush3.bf16.msra.mxu0 %v4499_v11 }
 0x8ac   :  { %4243 = vmatprep.subr.bf16.mxu0 %v4620_v1 }
 0x8af   :  { %4244 = vmatpush3.bf16.msra.mxu0 %v4501_v37 }
 0x8b0   :  { %4245 = vmatprep.subr.bf16.mxu0 %v4620_v1 }
 0x8b3   :  { %4246 = vmatpush3.bf16.msra.mxu0 %v4503_v27 }
 0x8b4   :  { %4247 = vmatprep.subr.bf16.mxu0 %v4620_v1 }
 0x8b7   :  { %4248 = vmatpush3.bf16.msra.mxu0 %v4505_v40  ;;  %v4516_v40 = vld [vmem:[%s5607_s11 + $0x8] ss:$12 sps:$4 sm:$0xff]  }
 0x8b8   :  { %4249 = vmatprep.subr.bf16.mxu0 %v4620_v1 }
 0x8bb   :  { %4250 = vmatpush3.bf16.msra.mxu0 %v4507_v42 }
 0x8bc   :  { %4251 = vmatprep.subr.bf16.mxu0 %v4620_v1 }
 0x8bf   :  { %4252 = vmatpush3.bf16.msra.mxu0 %v4509_v45 }
 0x8c0   :  { %4253 = vmatprep.subr.bf16.mxu0 %v4620_v1 }
 0x8c3   :  { %4254 = vmatpush3.bf16.msra.mxu0 %v4511_v47 }
 0x8c4   :  { %4285 = vmatprep.subr.bf16.mxu0 %v4620_v1 }
 0x979   :  { %v2108_v49 = vpop.f32.mrb[40].mxu0 }
 0x97a   :  { %v2109_v51 = vadd.f32 %v2108_v49, %v1999_v35  ;;  %v4237_v52 = vpop.f32.mrb[41].mxu0 }
 0x97b   :  { %v2111_v53 = vpop.f32.mrb[42].mxu0 }
 0x97c   :  { %v2122_v54 = vadd.f32 %v3679_v50, %v2109_v51  ;;  %v4238_v55 = vpop.f32.mrb[43].mxu0 }
 0x97e   :  { %v2124_v56 = vmul.f32 1.442695, %v2122_v54  ;;  %vm2123_vm14 = vcmp.gt.f32.partialorder %v2122_v54, 0.0 }
 0x980   :  { %4585 = vpow2.f32 %v2124_v56 }
 0x98a   :  { %v4586_v57 = vpop.eup %4585 }
 0x98b   :  { %v3680_v58 = vadd.f32 -1.0, %v4586_v57 }
 0x98d   :  { %v2127_v60 = vsel %vm2123_vm14, %v2122_v54, %v3680_v58  ;;  %v4517_v58 = vld [vmem:[%s5609_s13 + $0x40] sm:$0xff]  }
 0x98e   :  { %v2128_v61 = vpack.c.bf16 %v2127_v60, %v2127_v60  ;;  %v4518_v60 = vld [vmem:[%s5609_s13] sm:$0xff]  }
 0x990   :  { %4256 = vmatmul.mubr.bf16.vlgmr.msra.gmra.mrb[20].mxu0 %v2128_v61  ;;  %4276 = vmatmul.mubr.bf16.vlgmr.msra.gmra.mrb[44].mxu1 %v2128_v61  ;;  %v4519_v61 = vld [vmem:[%s5609_s13 + $0x48] sm:$0xff]  }
 0x991   :  { %4281 = vmatprep.mubr.msk.bf16.mxu1 %vm4621_vm1, %v4620_v1  ;;  %4287 = vmatprep.mubr.msk.bf16.mxu0 %vm4621_vm1, %v4620_v1 }
 0x992   :  { %4280 = vmatpush3.bf16.msra.mxu1 %v2347_v63  ;;  %v4521_v63 = vld [vmem:[%s5609_s13 + $0x50] sm:$0xff]  }
 0x993   :  { %2537 = vmatprep.subr.bf16.mxu1 %v4515_v5  ;;  %v2725_v5 = vsub.s32 1, %v4792_v18 }
 0xa63   :  { %v2228_v0 = vpop.f32.mrb[20].mxu0  ;;  %v2334_v2 = vpop.f32.mrb[44].mxu1 }
 0xa64   :  { %v2341_v3 = vpack.c.bf16 %v2228_v0, %v2228_v0  ;;  %v5329_v59 = vadd.f32 %v2334_v2, %v5253_v19  ;;  %v4257_v9 = vpop.f32.mrb[21].mxu0  ;;  %v4277_v10 = vpop.f32.mrb[45].mxu1  ;;  %v4522_v0 = vld [vmem:[%s5609_s13 + $0x10] sm:$0xff]   ;;  %v4524_v2 = vld [vmem:[%s5609_s13 + $0x58] sm:$0xff]  }
 0xa65   :  { %v2231_v12 = vpop.f32.mrb[22].mxu0  ;;  %v2337_v13 = vpop.f32.mrb[46].mxu1  ;;  %v4527_v9 = vld [vmem:[%s5609_s13 + $0x60] sm:$0xff]  }
 0xa66   :  { %v2452_v14 = vsel %vm340_vm6, %v2341_v3, 0  ;;  %v4258_v15 = vpop.f32.mrb[23].mxu0  ;;  %v4278_v7 = vpop.f32.mrb[47].mxu1  ;;  %4282 = vmatmul.mubr.msk.bf16.vlgmr.msra.gmra.mrb[48].mxu1 %vm321_vm4, %v2341_v3  ;;  %v4525_v3 = vld [vmem:[%s5609_s13 + $0x18] sm:$0xff]   ;;  %v4528_v10 = vld [vmem:[%s5609_s13 + $0x20] sm:$0xff]   ;;  %v4530_v12 = vld [vmem:[%s5609_s13 + $0x68] sm:$0xff]  }
 0xa67   :  { %4286 = vmatpush3.bf16.msra.mxu0 %v2452_v14  ;;  %2569 = vmatprep.mubr.bf16.mxu1 %v4623_v6  ;;  %v4531_v13 = vld [vmem:[%s5609_s13 + $0x28] sm:$0xff]   ;;  %v4533_v14 = vld [vmem:[%s5609_s13 + $0x70] sm:$0xff]   ;;  %v4536_v7 = vld [vmem:[%s5609_s13 + $0x78] sm:$0xff]  }
 0xa68   :  { %4291 = vmatprep.subr.bf16.mxu0 %v4620_v1  ;;  %2538 = vmatpush1.bf16.msra.mxu1 %v4513_v38  ;;  %v4534_v15 = vld [vmem:[%s5609_s13 + $0x30] sm:$0xff]  }
 0xa6e   :  { %3735 = vmatmul.mubr.msk.bf16.vlgmr.msra.gmra.mrb[52].mxu1 %vm87_vm0, %v4760_v4 }
 0xa6f   :  { %2665 = vmatprep.mubr.bf16.mxu1 %v4623_v6  ;;  %v2505_v6 = vrot.slane %v2502_v34, 4 }
 0xa71   :  { %v2506_v42 = vadd.f32 %v2505_v6, %v2502_v34 }
 0xa73   :  { %v2507_v44 = vrot.slane %v2506_v42, 2 }
 0xa75   :  { %v2508_v45 = vadd.f32 %v2507_v44, %v2506_v42 }
 0xa77   :  { %v2509_v46 = vrot.slane %v2508_v45, 1 }
 0xa79   :  { %v2510_v47 = vadd.f32 %v2509_v46, %v2508_v45 }
 0xa7b   :  { %v2513_v48 = vmax.f32 %v2510_v47, 1.0 }
 0xb39   :  { %v2383_v17 = vpop.f32.mrb[48].mxu1 }
 0xb3a   :  { %2389 = vxpose.xlu1.b32.start.end [1/1] (short) (narrow) %v2383_v17, 8  ;;  %2423 = vperm.xlu0 %4420, %v2383_v17   ;;  %v4283_v19 = vpop.f32.mrb[49].mxu1  ;;  %v4537_v17 = vld [vmem:[%s5609_s13 + $0x38] sm:$0xff]  }
 0xb3b   :  { %v2386_v21 = vpop.f32.mrb[50].mxu1 }
 0xb3c   :  { %v4284_v22 = vpop.f32.mrb[51].mxu1 }
 0xb41   :  { %v2571_v49 = vpop.f32.mrb[52].mxu1 }
 0xb42   :  { %v2618_v50 = vpack.c.bf16 %v2571_v49, %v2571_v49  ;;  %v2573_v51 = vpop.f32.mrb[53].mxu1 }
 0xb43   :  { %v2619_v52 = vpack.c.bf16 %v2573_v51, %v2573_v51  ;;  %v2575_v53 = vpop.f32.mrb[54].mxu1  ;;  %v2729_v51 = vsub.s32 2, %v4792_v18  ;;  %v4541_v18 = vld [vmem:[%s5611_s15] sm:$0xff]  }
 0xb44   :  { %v2625_v55 = vsel %vm340_vm6, %v2618_v50, 0  ;;  %v4540_v50 = vld [vmem:[%s5609_s13 + $0xb8] sm:$0xff]  }
 0xb45   :  { %3737 = vmatprep.subr.msk.bf16.mxu1 %vm340_vm6, %v2619_v52 }
 0xb46   :  { %2634 = vmatpush1.bf16.msra.mxu1 %v2625_v55 }
 0xb47   :  { %3920 = vmatprep.subr.bf16.mxu1 %v4517_v58 }
 0xbb9   :  { %v2424_v26 = vpop.permute.xlu0 %2423 }
 0xbba   :  { %v2405_v23 = vpop.trf.xlu1 }
 0xbbb   :  { %v2429_v25 = vrot.slane %v2405_v23, %v4795_v20 }
 0xbbd   :  { %v2430_v28 = vadd.f32 %v2429_v25, %v2424_v26 }
 0xbbf   :  { %vm2431_vm15 = vcmp.gt.f32.partialorder %v2430_v28, 0.0  ;;  %v2432_v29 = vmul.f32 0.2, %v2430_v28 }
 0xbc1   :  { %v2433_v30 = vsel %vm2431_vm15, %v2430_v28, %v2432_v29 }
 0xbc2   :  { %v2434_v31 = vsel %vm76_vm2, %v2433_v30, -1e+30 }
 0xbc3   :  { %v2435_v32 = vsel %vm321_vm4, %v2434_v31, -inf }
 0xbc4   :  { %2436 = vmax.xlane.f32.xlu1 %v2435_v32 }
 0xbc8   :  { %2503 = vadd.xlane.f32.xlu1 %v2502_v34  ;;  %v4529_v34 = vld [vmem:[%s5609_s13 + $0x90] sm:$0xff]  }
 0xc51   :  { %v2437_v16 = vpop.xlane.xlu1 %2436 }
 0xc52   :  { %v2438_v11 = vsub.f32 %v2434_v31, %v2437_v16  ;;  %v4532_v16 = vld [vmem:[%s5609_s13 + $0x98] sm:$0xff]  }
 0xc54   :  { %v2439_v35 = vmul.f32 1.442695, %v2438_v11  ;;  %v4535_v11 = vld [vmem:[%s5609_s13 + $0xa0] sm:$0xff]  }
 0xc56   :  { %4587 = vpow2.f32 %v2439_v35  ;;  %v4538_v35 = vld [vmem:[%s5609_s13 + $0xa8] sm:$0xff]  }
 0xc60   :  { %v4588_v36 = vpop.eup %4587 }
 0xc61   :  { %v2441_v37 = vmul.f32 %v4588_v36, %v4830_v43  ;;  %v2504_v36 = vpop.xlane.xlu1 %2503 }
 0xc63   :  { %v2442_v24 = vsel %vm321_vm4, %v2441_v37, 0.0 }
 0xc64   :  { %2443 = vadd.xlane.f32.xlu0 %v2442_v24  ;;  %v2717_v24 = vld [vmem:[%s5608_s12] sm:$0x7] }
 0xc65   :  { %v2730_v52 = vrot.slane %v2717_v24, %v2729_v51  ;;  %v4552_v51 = vld [vmem:[%s5616_s20 + $0x18] sm:$0xff]  }
 0xcf1   :  { %v2444_v8 = vpop.xlane.xlu0 %2443 }
 0xcf2   :  { %v2445_v43 = vmax.f32 %v2444_v8, 1e-20  ;;  %v2722_v8 = vrot.slane %v2717_v24, %v4795_v20  ;;  %v4539_v20 = vld [vmem:[%s5609_s13 + $0xb0] sm:$0xff]  }
 0xcf4   :  { %4589 = vrcp.f32 %v2445_v43 }
 0xcf5   :  { %4591 = vrsqrt.f32 %v2513_v48 }
 0xcfe   :  { %v4590_v27 = vpop.eup %4589 }
 0xcff   :  { %v2447_v39 = vmul.f32 %v4590_v27, %v2441_v37  ;;  %v4592_v54 = vpop.eup %4591  ;;  %v2511_v37 = vmax.f32 %v2504_v36, 1.0  ;;  %v2726_v27 = vrot.slane %v2717_v24, %v2725_v5 }
 0xd00   :  { %v2515_v56 = vmul.f32 %v4595_v33, %v4592_v54  ;;  %v4523_v33 = vld [vmem:[%s5609_s13 + $0x80] sm:$0xff]  }
 0xd01   :  { %v2448_v41 = vpack.c.bf16 %v2447_v39, %v2447_v39  ;;  %4593 = vrsqrt.f32 %v2511_v37 }
 0xd02   :  { %v5367_v57 = vpack.c.bf16 %v2515_v56, %v2515_v56 }
 0xd03   :  { %4288 = vmatmul.mubr.msk.bf16.vlgmr.msra.gmra.mrb[44].mxu0 %vm321_vm4, %v2448_v41 }
 0xd04   :  { %4292 = vmatpush3.bf16.msra.mxu0 %v4516_v40  ;;  %4293 = vmatprep.mubr.msk.bf16.mxu0 %vm4621_vm1, %v4620_v1 }
 0xd05   :  { %4297 = vmatprep.subr.bf16.mxu0 %v4620_v1  ;;  %3738 = vmatmul.mubr.msk.bf16.vlgmr.msra.gmra.mrb[56].mxu1 %vm321_vm4, %v5367_v57 }
 0xd06   :  { %3921 = vmatpush3.bf16.msra.mxu1 %v4518_v60 }
 0xd07   :  { %3922 = vmatprep.subr.bf16.mxu1 %v4519_v61 }
 0xd0a   :  { %3923 = vmatpush3.bf16.msra.mxu1 %v4520_v62 }
 0xd0b   :  { %4294 = vmatmul.mubr.msk.bf16.vlgmr.msra.gmra.mrb[48].mxu0 %vm87_vm0, %v4760_v4  ;;  %v2576_v4 = vpop.f32.mrb[55].mxu1  ;;  %3924 = vmatprep.subr.bf16.mxu1 %v4521_v63  ;;  %v5457_v38 = vpop.eup %4593 }
 0xd0c   :  { %4299 = vmatprep.mubr.msk.bf16.mxu0 %vm4621_vm1, %v4620_v1 }
 0xd0e   :  { %3925 = vmatpush3.bf16.msra.mxu1 %v4522_v0 }
 0xd0f   :  { %3926 = vmatprep.subr.bf16.mxu1 %v4524_v2 }
 0xd12   :  { %3927 = vmatpush3.bf16.msra.mxu1 %v4525_v3 }
 0xd13   :  { %3928 = vmatprep.subr.bf16.mxu1 %v4527_v9  ;;  %v4542_v9 = vld [vmem:[%s5611_s15 + $0x8] sm:$0xff]  }
 0xd16   :  { %3929 = vmatpush3.bf16.msra.mxu1 %v4528_v10  ;;  %v4543_v10 = vld [vmem:[%s5611_s15 + $0x10] sm:$0xff]  }
 0xd17   :  { %3930 = vmatprep.subr.bf16.mxu1 %v4530_v12  ;;  %v4544_v12 = vld [vmem:[%s5611_s15 + $0x18] sm:$0xff]  }
 0xd1a   :  { %3931 = vmatpush3.bf16.msra.mxu1 %v4531_v13  ;;  %v4545_v13 = vld [vmem:[%s5611_s15 + $0x20] sm:$0xff]  }
 0xd1b   :  { %3932 = vmatprep.subr.bf16.mxu1 %v4533_v14  ;;  %v4546_v14 = vld [vmem:[%s5611_s15 + $0x28] sm:$0xff]  }
 0xd1e   :  { %3933 = vmatpush3.bf16.msra.mxu1 %v4534_v15 }
 0xd1f   :  { %3934 = vmatprep.subr.bf16.mxu1 %v4536_v7 }
 0xd22   :  { %3935 = vmatpush3.bf16.msra.mxu1 %v4537_v17 }
 0xd23   :  { %4323 = vmatprep.subr.bf16.mxu1 %v4620_v1 }
 0xdd6   :  { %v2488_v19 = vpop.f32.mrb[44].mxu0 }
 0xdd7   :  { %v5421_v21 = vadd.f32 %v2488_v19, %v5329_v59  ;;  %v4289_v22 = vpop.f32.mrb[45].mxu0  ;;  %v4526_v59 = vld [vmem:[%s5609_s13 + $0x88] sm:$0xff]  }
 0xdd8   :  { %v2491_v23 = vpop.f32.mrb[46].mxu0  ;;  %v2667_v43 = vpop.f32.mrb[56].mxu1 }
 0xdd9   :  { %v4290_v25 = vpop.f32.mrb[47].mxu0  ;;  %v2714_v39 = vmul.f32 %v5457_v38, %v2667_v43  ;;  %v2669_v40 = vpop.f32.mrb[57].mxu1  ;;  %v3230_v43 = vld [vmem:[%s5614_s18] sm:$0xf] }
 0xdda   :  { %v2715_v41 = vmul.f32 %v5457_v38, %v2669_v40  ;;  %v2671_v6 = vpop.f32.mrb[58].mxu1  ;;  %v3775_v40 = vld [vmem:[%s5612_s16] ss:$0 sm:$0xff] }
 0xddb   :  { %v2734_v42 = vadd.f32 %v2722_v8, %v2714_v39  ;;  %v2672_v44 = vpop.f32.mrb[59].mxu1 }
 0xddc   :  { %v2735_v45 = vadd.f32 %v2726_v27, %v2715_v41  ;;  %v3235_v27 = vsel %vm340_vm6, %v3230_v43, 0 }
 0xddd   :  { %v2737_v46 = vmax.f32 %v2734_v42, 0.0  ;;  %v3228_v42 = vld [vmem:[%s5613_s17] sm:$0xf] }
 0xdde   :  { %v2612_v26 = vpop.f32.mrb[48].mxu0  ;;  %v2738_v47 = vmax.f32 %v2735_v45, 0.0 }
 0xddf   :  { %v2620_v28 = vpack.c.bf16 %v2612_v26, %v2612_v26  ;;  %v4295_v29 = vpop.f32.mrb[49].mxu0  ;;  %v2740_v48 = vpack.c.bf16 %v2737_v46, %v2737_v46  ;;  %v4547_v26 = vld [vmem:[%s5611_s15 + $0x30] sm:$0xff]  }
 0xde0   :  { %v2615_v30 = vpop.f32.mrb[50].mxu0  ;;  %v2741_v49 = vpack.c.bf16 %v2738_v47, %v2738_v47  ;;  %v3281_v47 = vsel %vm340_vm6, %v3228_v42, 0 }
 0xde1   :  { %v2631_v31 = vsel %vm340_vm6, %v2620_v28, 0  ;;  %v4296_v32 = vpop.f32.mrb[51].mxu0  ;;  %v4548_v28 = vld [vmem:[%s5611_s15 + $0x38] sm:$0xff]   ;;  %v3765_v30 = vld [vmem:[%s5610_s14] ss:$0 sm:$0xff]  ;;  %s4631_s14 = smov [#allocation2]  }
 0xde2   :  { %4298 = vmatpush3.bf16.msra.mxu0 %v2631_v31  ;;  %2967 = vmatprep.mubr.bf16.mxu1 %v2741_v49  ;;  %v4549_v49 = vld [vmem:[%s5616_s20] sm:$0xff]   ;;  %s3453_s15 = sshll.u32 %s4631_s14, 4  ;;  %s3454_s15 = int_to_ptr.vmem [resolvable:$true] %s3453_s15 }
 0xde3   :  { %4303 = vmatprep.subr.bf16.mxu0 %v4620_v1  ;;  %2968 = vmatmul.mubr.bf16.vlgmr.msra.gmra.mrb[60].mxu1 %v2740_v48  ;;  %v3731_v48 = vld [vmem:[%s5606_s10] ss:$0 sm:$0xff]  ;;  %p4601_p1 = scmp.lt.s32.totalorder %s3454_s15, %s3454_s15 }
 0xde4   :  { %4325 = vmatprep.mubr.msk.bf16.mxu1 %vm4621_vm1, %v4620_v1 }
 0xde5   :  { %4300 = vmatmul.mubr.msk.bf16.vlgmr.msra.gmra.mrb[52].mxu0 %vm321_vm4, %v5367_v57 }
 0xde6   :  { %4304 = vmatpush3.bf16.msra.mxu0 %v4523_v33  ;;  %4319 = vmatprep.mubr.msk.bf16.mxu0 %vm4621_vm1, %v4620_v1 }
 0xde7   :  { %4305 = vmatprep.subr.bf16.mxu0 %v4620_v1 }
 0xdea   :  { %4306 = vmatpush3.bf16.msra.mxu0 %v4526_v59 }
 0xdeb   :  { %4307 = vmatprep.subr.bf16.mxu0 %v4620_v1 }
 0xdee   :  { %4308 = vmatpush3.bf16.msra.mxu0 %v4529_v34 }
 0xdef   :  { %4309 = vmatprep.subr.bf16.mxu0 %v4620_v1 }
 0xdf2   :  { %4310 = vmatpush3.bf16.msra.mxu0 %v4532_v16 }
 0xdf3   :  { %4311 = vmatprep.subr.bf16.mxu0 %v4620_v1 }
 0xdf6   :  { %4312 = vmatpush3.bf16.msra.mxu0 %v4535_v11 }
 0xdf7   :  { %4313 = vmatprep.subr.bf16.mxu0 %v4620_v1 }
 0xdfa   :  { %4314 = vmatpush3.bf16.msra.mxu0 %v4538_v35 }
 0xdfb   :  { %4315 = vmatprep.subr.bf16.mxu0 %v4620_v1 }
 0xdfe   :  { %4316 = vmatpush3.bf16.msra.mxu0 %v4539_v20 }
 0xdff   :  { %4317 = vmatprep.subr.bf16.mxu0 %v4620_v1 }
 0xe02   :  { %4318 = vmatpush3.bf16.msra.mxu0 %v4540_v50  ;;  %v4550_v50 = vld [vmem:[%s5616_s20 + $0x8] sm:$0xff]  }
 0xe03   :  { %4329 = vmatprep.subr.bf16.mxu0 %v4620_v1 }
 0xeb6   :  { %v3936_v62 = vpop.f32.mrb[60].mxu1 }
 0xeb7   :  { %v3937_v63 = vpop.f32.mrb[61].mxu1 }
 0xeb8   :  { %v2708_v53 = vpop.f32.mrb[52].mxu0  ;;  %v3938_v0 = vadd.f32 %v3937_v63, %v3936_v62  ;;  %v3939_v2 = vpop.f32.mrb[62].mxu1  ;;  %v3778_v62 = vld [vmem:[%s5615_s19] ss:$0 sm:$0xff]  ;;  %s4596_s19 = scalar_lea.vmem %s3454_s15, 128 }
 0xeb9   :  { %v2716_v54 = vmul.f32 %v5457_v38, %v2708_v53  ;;  %v4301_v55 = vpop.f32.mrb[53].mxu0  ;;  %v3940_v3 = vpop.f32.mrb[63].mxu1  ;;  %v4554_v53 = vld [vmem:[%s5616_s20 + $0x28] sm:$0xff]   ;;  %p4597_p0 = scmp.ne.s32.totalorder %s3454_s15, %s4596_s19  ;;  %p4602_p2 = scmp.lt.s32.totalorder %s4596_s19, %s4596_s19 }
 0xeba   :  { %v2711_v4 = vpop.f32.mrb[54].mxu0  ;;  %v4556_v55 = vld [vmem:[%s5616_s20 + $0x38] sm:$0xff]  }
 0xebb   :  { %v2736_v56 = vadd.f32 %v2730_v52, %v2716_v54  ;;  %v4302_v58 = vpop.f32.mrb[55].mxu0  ;;  %v4553_v52 = vld [vmem:[%s5616_s20 + $0x20] sm:$0xff]   ;;  %v4555_v54 = vld [vmem:[%s5616_s20 + $0x30] sm:$0xff]   ;;  %p4603_p3 = por %p4602_p2, %p4601_p1 }
 0xebd   :  { %v2739_v60 = vmax.f32 %v2736_v56, 0.0  ;;  %p4604_p4 = pnand %p4603_p3, %p4597_p0 }
 0xebf   :  { %v2742_v61 = vpack.c.bf16 %v2739_v60, %v2739_v60 }
 0xec1   :  { %4320 = vmatmul.mubr.bf16.vlgmr.msra.gmra.mrb[56].mxu0 %v2742_v61 }
 0xec2   :  { %4345 = vmatprep.mubr.msk.bf16.mxu0 %vm4621_vm1, %v4620_v1  ;;  %4330 = vmatpush3.bf16.msra.mxu0 %v4541_v18 }
 0xec3   :  { %4331 = vmatprep.subr.bf16.mxu0 %v4620_v1 }
 0xec6   :  { %4332 = vmatpush3.bf16.msra.mxu0 %v4542_v9 }
 0xec7   :  { %4333 = vmatprep.subr.bf16.mxu0 %v4620_v1 }
 0xeca   :  { %4334 = vmatpush3.bf16.msra.mxu0 %v4543_v10 }
 0xecb   :  { %4335 = vmatprep.subr.bf16.mxu0 %v4620_v1 }
 0xece   :  { %4336 = vmatpush3.bf16.msra.mxu0 %v4544_v12  ;;  %v3779_v12 = vld [vmem:[%s5617_s21] ss:$0 sm:$0xff] }
 0xecf   :  { %4337 = vmatprep.subr.bf16.mxu0 %v4620_v1 }
 0xed2   :  { %4338 = vmatpush3.bf16.msra.mxu0 %v4545_v13 }
 0xed3   :  { %4339 = vmatprep.subr.bf16.mxu0 %v4620_v1 }
 0xed6   :  { %4340 = vmatpush3.bf16.msra.mxu0 %v4546_v14 }
 0xed7   :  { %4341 = vmatprep.subr.bf16.mxu0 %v4620_v1 }
 0xeda   :  { %4342 = vmatpush3.bf16.msra.mxu0 %v4547_v26 }
 0xedb   :  { %4343 = vmatprep.subr.bf16.mxu0 %v4620_v1 }
 0xede   :  { %4344 = vmatpush3.bf16.msra.mxu0 %v4548_v28 }
 0xf94   :  { %v3009_v15 = vpop.f32.mrb[56].mxu0 }
 0xf95   :  { %v3010_v7 = vadd.f32 %v3938_v0, %v3009_v15  ;;  %v4321_v17 = vpop.f32.mrb[57].mxu0 }
 0xf96   :  { %v3012_v19 = vpop.f32.mrb[58].mxu0 }
 0xf97   :  { %v3015_v22 = vpack.c.bf16 %v3010_v7, %v3010_v7  ;;  %v4322_v23 = vpop.f32.mrb[59].mxu0 }
 0xf99   :  { %v3017_v25 = vsel %vm340_vm6, %v3015_v22, 0 }
 0xf9a   :  { %4324 = vmatpush3.bf16.msra.mxu1 %v3017_v25 }
 0xf9b   :  { %4349 = vmatprep.subr.bf16.mxu1 %v4620_v1 }
 0xf9d   :  { %4326 = vmatmul.mubr.msk.bf16.vlgmr.msra.gmra.mrb[64].mxu1 %vm321_vm4, %v5367_v57 }
 0xf9e   :  { %4351 = vmatprep.mubr.msk.bf16.mxu1 %vm4621_vm1, %v4620_v1 }
0x1070   :  { %v3053_v29 = vpop.f32.mrb[64].mxu1 }
0x1071   :  { %v3059_v31 = vmul.f32 %v5457_v38, %v3053_v29  ;;  %v4327_v32 = vpop.f32.mrb[65].mxu1 }
0x1072   :  { %v3056_v33 = vpop.f32.mrb[66].mxu1 }
0x1073   :  { %v3067_v59 = vadd.f32 %v3765_v30, %v3059_v31  ;;  %v4328_v34 = vpop.f32.mrb[67].mxu1 }
0x1075   :  { %v3068_v16 = vmax.f32 %v3067_v59, 0.0 }
0x1077   :  { %v3069_v11 = vpack.c.bf16 %v3068_v16, %v3068_v16 }
0x1079   :  { %4346 = vmatmul.mubr.bf16.vlgmr.msra.gmra.mrb[60].mxu0 %v3069_v11 }
0x114c   :  { %v3168_v35 = vpop.f32.mrb[60].mxu0 }
0x114d   :  { %v3174_v36 = vpack.c.bf16 %v3168_v35, %v3168_v35  ;;  %v4347_v37 = vpop.f32.mrb[61].mxu0 }
0x114e   :  { %v3171_v24 = vpop.f32.mrb[62].mxu0 }
0x114f   :  { %v3176_v5 = vsel %vm340_vm6, %v3174_v36, 0  ;;  %v4348_v8 = vpop.f32.mrb[63].mxu0 }
0x1150   :  { %4350 = vmatpush3.bf16.msra.mxu1 %v3176_v5 }
0x1151   :  { %4355 = vmatprep.subr.bf16.mxu1 %v4620_v1 }
0x1153   :  { %4352 = vmatmul.mubr.msk.bf16.vlgmr.msra.gmra.mrb[68].mxu1 %vm321_vm4, %v5367_v57 }
0x1154   :  { %4357 = vmatprep.mubr.msk.bf16.mxu1 %vm4621_vm1, %v4620_v1  ;;  %4356 = vmatpush3.bf16.msra.mxu1 %v3235_v27 }
0x1155   :  { %4361 = vmatprep.subr.bf16.mxu1 %v4620_v1 }
0x1226   :  { %v3212_v39 = vpop.f32.mrb[68].mxu1 }
0x1227   :  { %v3218_v41 = vmul.f32 %v5457_v38, %v3212_v39  ;;  %v4353_v57 = vpop.f32.mrb[69].mxu1  ;;  %v2501_v38 = vadd.f32 %v3731_v48, %v5421_v21  ;;  %v4551_v21 = vld [vmem:[%s5616_s20 + $0x10] sm:$0xff]  }
0x1228   :  { %v3215_v6 = vpop.f32.mrb[70].mxu1 }
0x1229   :  { %v3226_v44 = vadd.f32 %v3775_v40, %v3218_v41  ;;  %v4354_v45 = vpop.f32.mrb[71].mxu1  ;;  %v3227_v20 = vpack.c.bf16 %v2501_v38, %v2501_v38 }
0x122b   :  { %v3229_v46 = vpack.c.bf16 %v3226_v44, %v3226_v44 }
0x122d   :  { %4358 = vmatmul.mubr.msk.bf16.vlgmr.msra.gmra.mrb[72].mxu1 %vm321_vm4, %v3229_v46 }
0x122e   :  { %4362 = vmatpush3.bf16.msra.mxu1 %v3281_v47  ;;  %4363 = vmatprep.mubr.msk.bf16.mxu1 %vm4621_vm1, %v4620_v1 }
0x122f   :  { %4367 = vmatprep.subr.bf16.mxu1 %v4620_v1 }
0x1235   :  { %4364 = vmatmul.mubr.msk.bf16.vlgmr.msra.gmra.mrb[76].mxu1 %vm321_vm4, %v3227_v20 }
0x1236   :  { %4368 = vmatpush3.bf16.msra.mxu1 %v4549_v49  ;;  %4383 = vmatprep.mubr.msk.bf16.mxu1 %vm4621_vm1, %v4620_v1 }
0x1237   :  { %4369 = vmatprep.subr.bf16.mxu1 %v4620_v1 }
0x123a   :  { %4370 = vmatpush3.bf16.msra.mxu1 %v4550_v50 }
0x123b   :  { %4371 = vmatprep.subr.bf16.mxu1 %v4620_v1 }
0x123e   :  { %4372 = vmatpush3.bf16.msra.mxu1 %v4551_v21 }
0x123f   :  { %4373 = vmatprep.subr.bf16.mxu1 %v4620_v1 }
0x1242   :  { %4374 = vmatpush3.bf16.msra.mxu1 %v4552_v51 }
0x1243   :  { %4375 = vmatprep.subr.bf16.mxu1 %v4620_v1 }
0x1246   :  { %4376 = vmatpush3.bf16.msra.mxu1 %v4553_v52 }
0x1247   :  { %4377 = vmatprep.subr.bf16.mxu1 %v4620_v1 }
0x124a   :  { %4378 = vmatpush3.bf16.msra.mxu1 %v4554_v53 }
0x124b   :  { %4379 = vmatprep.subr.bf16.mxu1 %v4620_v1 }
0x124e   :  { %4380 = vmatpush3.bf16.msra.mxu1 %v4555_v54 }
0x124f   :  { %4381 = vmatprep.subr.bf16.mxu1 %v4620_v1 }
0x1252   :  { %4382 = vmatpush3.bf16.msra.mxu1 %v4556_v55 }
0x1300   :  { %v3271_v4 = vpop.f32.mrb[72].mxu1 }
0x1301   :  { %v4359_v56 = vpop.f32.mrb[73].mxu1 }
0x1302   :  { %v3274_v58 = vpop.f32.mrb[74].mxu1 }
0x1303   :  { %v4360_v60 = vpop.f32.mrb[75].mxu1 }
0x1308   :  { %v3317_v61 = vpop.f32.mrb[76].mxu1 }
0x1309   :  { %v3318_v63 = vadd.f32 %v3317_v61, %v3271_v4  ;;  %v4365_v0 = vpop.f32.mrb[77].mxu1 }
0x130a   :  { %v3320_v2 = vpop.f32.mrb[78].mxu1 }
0x130b   :  { %v3330_v3 = vadd.f32 %v3778_v62, %v3318_v63  ;;  %v4366_v18 = vpop.f32.mrb[79].mxu1 }
0x130d   :  { %vm3331_vm0 = vcmp.gt.f32.partialorder %v3330_v3, 0.0  ;;  %v3332_v1 = vmul.f32 0.25, %v3330_v3 }
0x130f   :  { %v3333_v9 = vsel %vm3331_vm0, %v3330_v3, %v3332_v1 }
0x1310   :  { %v3334_v10 = vpack.c.bf16 %v3333_v9, %v3333_v9 }
0x1312   :  { %4384 = vmatmul.mubr.bf16.vlgmr.msra.gmra.mrb[80].mxu1 %v3334_v10 }
0x13e5   :  { %v3440_v13 = vpop.f32.mrb[80].mxu1 }
0x13e6   :  { %v3441_v14 = vadd.f32 %v3779_v12, %v3440_v13  ;;  %v4385_v15 = vpop.f32.mrb[81].mxu1 }
0x13e7   :  { %v3443_v7 = vpop.f32.mrb[82].mxu1 }
0x13e8   :  { %3446 = vst [vmem:[#allocation2] sm:$0xff] %v3441_v14  ;;  %v4386_v17 = vpop.f32.mrb[83].mxu1 }
0x13e9   :  { %4607 = shalt.err (!%p4604_p4)
}
0x13ea   :  { %s4608_s21 = scalar_lea.hbm %s5618_s22, 128 }
0x13eb   :  { %p4609_p5 = scmp.ne.s32.totalorder %s5618_s22, %s4608_s21  ;;  %p4612_p6 = scmp.lt.u32.totalorder %s4608_s21, %s5618_s22 }
0x13ed   :  { %p4614_p7 = pnand %p4612_p6, %p4609_p5 }
0x13ef   :  { %4617 = shalt.err (!%p4614_p7)
}
0x13f0   :  { %3456 = dma.vmem_to_hbm [thread:$0]  %s3454_s15, 128, %s5618_s22, [#allocation3]  }
0x13f1   :  { %4618 = dma.done.wait [#allocation3], 128  }
0x13f2   :  { %4619 = vsyncadd [#allocation3], 4294967168 }
0x13f3   :  { %3460 = vsyncpa [#allocation3], 1 }

</bundles_post_ra>
